<compile_context>
chip_gen: v7x
topology: tpu7x:2x2x1
jax: 0.10.0
libtpu: 0.0.40
codegen_flags: <defaults>
</compile_context>

<pallas_src>
import jax
import jax.numpy as jnp
import numpy as np
from jax import lax
from jax.experimental import pallas as pl
from jax.experimental.pallas import tpu as pltpu

NEG_SLOPE = 0.01   # nn.LeakyReLU default negative_slope
BN_EPS = 1e-5      # nn.BatchNorm1d default eps
KS = 3             # conv3d kernel size
PS = 2             # max pool kernel size
OC = 2             # conv output channels (num_out_chan)
KT = KS ** 3       # 27 conv taps
NPH = PS ** 3      # 8 pooling phases (offsets inside a 2x2x2 pool window)


def _leaky_relu(x):
    return jnp.where(x >= 0, x, NEG_SLOPE * x)


def fused_kernel(cw_ref, cb_ref, patches_ref, w1_ref, b1_ref,
                 scale_ref, shift_ref, w2_ref, b2_ref, o_ref):
    """Whole forward pass for one batch tile.

    cw_ref      : SMEM (OC, KT) f32  conv taps (scalars)
    cb_ref      : SMEM (OC,)    f32  conv bias
    patches_ref : (KT, tile_n*NPH, spat)  im2col'd input; row r = n*NPH + phase,
                  lane s = pooled spatial index (d,h,w row-major).  f32 or bf16.
    w1_ref      : (OC, spat, fc_dim)  fc1 weight split per conv channel
                  (oc-major rows of PyTorch's .view(N,-1) layout).
    b1/scale/shift : (1, fc_dim)  fc1 bias and folded BatchNorm1d params.
    w2_ref      : (fc_dim, out_pad)  fc2 weight zero-padded to 128 lanes.
    b2_ref      : (1, out_pad)
    o_ref       : (1, tile_n, out_pad)  lane-dense output slab.
    """
    rows, spat = patches_ref.shape[1], patches_ref.shape[2]
    tile_n = rows // NPH

    # Conv3d(1->OC, k=3): 27 lane-dense scalar-broadcast FMAs per channel on
    # the VPU.  Two partial accumulators per channel (even/odd taps) for ILP.
    acc = [jnp.zeros((rows, spat), jnp.float32) for _ in range(2 * OC)]
    for k in range(KT):                               # static unroll, 27 taps
        p = patches_ref[k].astype(jnp.float32)        # upcast after load
        sel = k & 1
        for oc in range(OC):
            acc[2 * oc + sel] = acc[2 * oc + sel] + p * cw_ref[oc, k]

    # LeakyReLU -> 2x2x2 MaxPool (max over the NPH phase rows of each sample)
    # -> per-channel partial fc1 matmul (builds the oc-major feature order
    # without materializing a cross-lane concat).
    h = b1_ref[...]                                   # (1, fc_dim), broadcasts
    for oc in range(OC):
        conv = _leaky_relu(acc[2 * oc] + acc[2 * oc + 1] + cb_ref[oc])
        feat = jnp.max(conv.reshape(tile_n, NPH, spat), axis=1)    # (tile_n, spat)
        h = h + jnp.dot(feat, w1_ref[oc], preferred_element_type=jnp.float32)

    h = _leaky_relu(h)
    h = h * scale_ref[...] + shift_ref[...]           # BatchNorm1d (running stats), folded
    # TODO(synk): nn.Dropout(p=0.15) is identity at inference; training-mode RNG masking not implemented.
    out = jnp.dot(h, w2_ref[...], preferred_element_type=jnp.float32) + b2_ref[...]
    o_ref[...] = out[None]                            # (1, tile_n, out_pad) lane-dense store


def _im2col_pooled_phases(xk):
    """(N, D, H, W) -> (KT, N*NPH, Dp*Hp*Wp) patches aligned with the pooled layout.

    Pure layout plumbing (slices / transpose / reshape), no arithmetic.
    """
    N, D, H, W = xk.shape
    Do, Ho, Wo = D - (KS - 1), H - (KS - 1), W - (KS - 1)
    Dp, Hp, Wp = Do // PS, Ho // PS, Wo // PS
    wins = jnp.stack(
        [xk[:, kd:kd + Do, kh:kh + Ho, kw:kw + Wo]
         for kd in range(KS) for kh in range(KS) for kw in range(KS)], axis=0)
    wins = wins[:, :, :PS * Dp, :PS * Hp, :PS * Wp]    # drop pool remainder (none here)
    wins = wins.reshape(KT, N, Dp, PS, Hp, PS, Wp, PS)
    wins = wins.transpose(0, 1, 3, 5, 7, 2, 4, 6)      # (KT, N, pd,ph,pw, Dp,Hp,Wp)
    return wins.reshape(KT, N * NPH, Dp * Hp * Wp)


def _choose_tile_n(n, spat):
    """Largest divisor of n within the VMEM budget that keeps grid >= 2 for n >= 2."""
    per_n_bytes = KT * NPH * spat * 4                  # f32 patch bytes per sample
    cap = max(1, (8 * 1024 * 1024) // (2 * per_n_bytes))   # ~8 MiB double-buffered
    cap = min(cap, 32)                                 # v7x (64 MiB VMEM)-safe ceiling
    if n >= 2:
        cap = min(cap, n // 2)                         # grid >= 2: use both v7x TCs
    cap = max(cap, 1)
    tile_n = 1
    for d in range(1, cap + 1):
        if n % d == 0:
            tile_n = d
    return tile_n


@jax.jit
def nn_conv3d_simple_forward(x, params):
    """x: (N, 1, D, H, W) float32 (PyTorch NCDHW-style)."""
    N, C, D, H, W = x.shape
    assert C == 1
    Do, Ho, Wo = D - (KS - 1), H - (KS - 1), W - (KS - 1)
    Dp, Hp, Wp = Do // PS, Ho // PS, Wo // PS
    spat = Dp * Hp * Wp
    fc_in = OC * spat                                  # PyTorch .view(N,-1) width
    fc_dim = params["w1"].shape[1]
    out_dim = params["w2"].shape[1]
    out_pad = ((out_dim + 127) // 128) * 128           # lane-dense output slab width

    # ---- layout / parameter plumbing (no per-activation arithmetic) ----
    patches = _im2col_pooled_phases(x[:, 0])           # (KT, N*NPH, spat)

    tile_n = _choose_tile_n(N, spat)
    grid = (N // tile_n,)
    rows = tile_n * NPH

    # bf16 halves the dominant HBM stream; only when the block respects bf16
    # (16,128) sublane packing (true for even tile_n or a single full block).
    if rows % 16 == 0 or tile_n == N:
        patches = patches.astype(jnp.bfloat16)

    cw = params["conv_w"].reshape(OC, KT).astype(jnp.float32)       # SMEM scalar taps
    cb = params["conv_b"].reshape(OC).astype(jnp.float32)
    w1 = params["w1"].reshape(OC, spat, fc_dim)        # per-oc slabs of fc1 weight
    b1 = params["b1"].reshape(1, fc_dim)
    # BatchNorm1d (inference) folded into scale/shift (parameter-only precompute).
    inv_std = lax.rsqrt(params["var"].reshape(1, fc_dim) + BN_EPS)
    scale = params["gamma"].reshape(1, fc_dim) * inv_std
    shift = params["beta"].reshape(1, fc_dim) - params["mean"].reshape(1, fc_dim) * scale
    # fc2 zero-padded to 128 lanes -> kernel's only store is lane-dense.
    w2p = jnp.zeros((fc_dim, out_pad), jnp.float32).at[:, :out_dim].set(params["w2"])
    b2p = jnp.zeros((1, out_pad), jnp.float32).at[:, :out_dim].set(
        params["b2"].reshape(1, out_dim))

    flops = (2 * KT * OC * N * NPH * spat              # conv FMAs
             + OC * N * (NPH - 1) * spat               # pool maxes
             + 2 * N * fc_in * fc_dim                  # fc1
             + 2 * N * fc_dim * out_pad)               # fc2 (padded)
    bytes_accessed = int(patches.size * patches.dtype.itemsize
                         + 4 * (cw.size + cb.size + w1.size + b1.size + scale.size
                                + shift.size + w2p.size + b2p.size + N * out_pad))
    cost = pl.CostEstimate(flops=int(flops), transcendentals=0,
                           bytes_accessed=bytes_accessed)

    out = pl.pallas_call(
        fused_kernel,
        out_shape=jax.ShapeDtypeStruct((grid[0], tile_n, out_pad), jnp.float32),
        grid=grid,
        in_specs=[
            pl.BlockSpec(memory_space=pltpu.MemorySpace.SMEM),       # conv weights (scalars)
            pl.BlockSpec(memory_space=pltpu.MemorySpace.SMEM),       # conv bias (scalars)
            pl.BlockSpec((KT, rows, spat), lambda i: (0, i, 0)),     # im2col patches
            pl.BlockSpec((OC, spat, fc_dim), lambda i: (0, 0, 0)),   # w1 (per-oc)
            pl.BlockSpec((1, fc_dim), lambda i: (0, 0)),             # b1
            pl.BlockSpec((1, fc_dim), lambda i: (0, 0)),             # BN scale
            pl.BlockSpec((1, fc_dim), lambda i: (0, 0)),             # BN shift
            pl.BlockSpec((fc_dim, out_pad), lambda i: (0, 0)),       # w2 (lane-padded)
            pl.BlockSpec((1, out_pad), lambda i: (0, 0)),            # b2 (lane-padded)
        ],
        out_specs=pl.BlockSpec((1, tile_n, out_pad), lambda i: (i, 0, 0)),
        compiler_params=pltpu.CompilerParams(
            dimension_semantics=("parallel",),
            vmem_limit_bytes=32 * 1024 * 1024),
        cost_estimate=cost,
    )(cw, cb, patches, w1, b1, scale, shift, w2p, b2p)

    return out.reshape(N, out_pad)[:, :out_dim]


def reference_forward(x, params):
    """Pure-JAX reference mirroring the PyTorch module (inference mode)."""
    conv = lax.conv_general_dilated(
        x, params["conv_w"], window_strides=(1, 1, 1), padding="VALID",
        dimension_numbers=("NCDHW", "OIDHW", "NCDHW"),
        precision=lax.Precision.HIGHEST)
    conv = conv + params["conv_b"].reshape(1, -1, 1, 1, 1)
    conv = _leaky_relu(conv)
    pooled = lax.reduce_window(conv, -jnp.inf, lax.max,
                               (1, 1, PS, PS, PS), (1, 1, PS, PS, PS), "VALID")
    f = pooled.reshape(pooled.shape[0], -1)
    h = jnp.matmul(f, params["w1"], precision=lax.Precision.HIGHEST) + params["b1"]
    h = _leaky_relu(h)
    h = (h - params["mean"]) * lax.rsqrt(params["var"] + BN_EPS) * params["gamma"] \
        + params["beta"]
    return jnp.matmul(h, params["w2"], precision=lax.Precision.HIGHEST) + params["b2"]


if __name__ == "__main__":
    # Small shapes consistent with the module: batch=2, 10x10x10 volume,
    # fc_dim=32, output_dim=8.  fc_in_dim = 2 * 4 * 4 * 4 = 128.
    N, D, H, W = 2, 10, 10, 10
    fc_dim, output_dim = 32, 8
    Dp = Hp = Wp = (D - (KS - 1)) // PS
    fc_in = OC * Dp * Hp * Wp

    key = jax.random.PRNGKey(0)
    ks = jax.random.split(key, 12)
    params = {
        "conv_w": 0.2 * jax.random.normal(ks[0], (OC, 1, KS, KS, KS), jnp.float32),
        "conv_b": 0.1 * jax.random.normal(ks[1], (OC,), jnp.float32),
        "w1": jax.random.normal(ks[2], (fc_in, fc_dim), jnp.float32) / np.sqrt(fc_in),
        "b1": 0.05 * jax.random.normal(ks[3], (1, fc_dim), jnp.float32),
        "gamma": 1.0 + 0.1 * jax.random.normal(ks[4], (1, fc_dim), jnp.float32),
        "beta": 0.1 * jax.random.normal(ks[5], (1, fc_dim), jnp.float32),
        "mean": 0.1 * jax.random.normal(ks[6], (1, fc_dim), jnp.float32),
        "var": 1.0 + 0.1 * jax.random.uniform(ks[7], (1, fc_dim), jnp.float32),
        "w2": jax.random.normal(ks[8], (fc_dim, output_dim), jnp.float32) / np.sqrt(fc_dim),
        "b2": 0.05 * jax.random.normal(ks[9], (1, output_dim), jnp.float32),
    }
    x = jax.random.normal(ks[10], (N, 1, D, H, W), jnp.float32)

    out = jax.block_until_ready(nn_conv3d_simple_forward(x, params))
    ref = jax.block_until_ready(reference_forward(x, params))
    np.testing.assert_allclose(np.asarray(out), np.asarray(ref),
                               rtol=2e-2, atol=2e-2)

    print("KERNEL_OK")
</pallas_src>

<mosaic_0001>
module attributes {stable_mosaic.version = 11 : i64} {
  func.func @fused_kernel(%arg0: i32, %arg1: memref<2x27xf32, #tpu.memory_space<smem>>, %arg2: memref<2xf32, #tpu.memory_space<smem>>, %arg3: memref<27x8x64xf32, #tpu.memory_space<vmem>>, %arg4: memref<2x64x32xf32, #tpu.memory_space<vmem>>, %arg5: memref<1x32xf32, #tpu.memory_space<vmem>>, %arg6: memref<1x32xf32, #tpu.memory_space<vmem>>, %arg7: memref<1x32xf32, #tpu.memory_space<vmem>>, %arg8: memref<32x128xf32, #tpu.memory_space<vmem>>, %arg9: memref<1x128xf32, #tpu.memory_space<vmem>>, %arg10: memref<1x1x128xf32, #tpu.memory_space<vmem>>) attributes {dimension_semantics = [#tpu.dimension_semantics<parallel>], iteration_bounds = array<i64: 2>, scalar_prefetch = 0 : i64, scratch_operands = 0 : i64, tpu.core_type = #tpu.core_type<tc>, window_params = [{transform_indices = @transform_0, window_bounds = array<i64: 2, 27>}, {transform_indices = @transform_1, window_bounds = array<i64: 2>}, {transform_indices = @transform_2, window_bounds = array<i64: 27, 8, 64>}, {pipeline_mode = #tpu.pipeline_mode<synchronous>, transform_indices = @transform_3, window_bounds = array<i64: 2, 64, 32>}, {pipeline_mode = #tpu.pipeline_mode<synchronous>, transform_indices = @transform_4, window_bounds = array<i64: 1, 32>}, {pipeline_mode = #tpu.pipeline_mode<synchronous>, transform_indices = @transform_5, window_bounds = array<i64: 1, 32>}, {pipeline_mode = #tpu.pipeline_mode<synchronous>, transform_indices = @transform_6, window_bounds = array<i64: 1, 32>}, {pipeline_mode = #tpu.pipeline_mode<synchronous>, transform_indices = @transform_7, window_bounds = array<i64: 32, 128>}, {pipeline_mode = #tpu.pipeline_mode<synchronous>, transform_indices = @transform_8, window_bounds = array<i64: 1, 128>}, {transform_indices = @transform_9, window_bounds = array<i64: 1, 1, 128>}]} {
    %cst = arith.constant 0.000000e+00 : f32
    %0 = vector.broadcast %cst : f32 to vector<8x64xf32>
    %cst_0 = arith.constant 0.000000e+00 : f32
    %1 = vector.broadcast %cst_0 : f32 to vector<8x64xf32>
    %cst_1 = arith.constant 0.000000e+00 : f32
    %2 = vector.broadcast %cst_1 : f32 to vector<8x64xf32>
    %cst_2 = arith.constant 0.000000e+00 : f32
    %3 = vector.broadcast %cst_2 : f32 to vector<8x64xf32>
    %c0 = arith.constant 0 : index
    %c0_3 = arith.constant 0 : index
    %c0_4 = arith.constant 0 : index
    %4 = vector.load %arg3[%c0, %c0_3, %c0_4] : memref<27x8x64xf32, #tpu.memory_space<vmem>>, vector<1x8x64xf32>
    %5 = vector.shape_cast %4 : vector<1x8x64xf32> to vector<8x64xf32>
    %c0_5 = arith.constant 0 : index
    %c0_6 = arith.constant 0 : index
    %6 = memref.load %arg1[%c0_5, %c0_6] : memref<2x27xf32, #tpu.memory_space<smem>>
    %7 = vector.broadcast %6 : f32 to vector<8x64xf32>
    %8 = arith.mulf %5, %7 : vector<8x64xf32>
    %9 = arith.addf %0, %8 : vector<8x64xf32>
    %c1 = arith.constant 1 : index
    %c0_7 = arith.constant 0 : index
    %10 = memref.load %arg1[%c1, %c0_7] : memref<2x27xf32, #tpu.memory_space<smem>>
    %11 = vector.broadcast %10 : f32 to vector<8x64xf32>
    %12 = arith.mulf %5, %11 : vector<8x64xf32>
    %13 = arith.addf %2, %12 : vector<8x64xf32>
    %c1_8 = arith.constant 1 : index
    %c0_9 = arith.constant 0 : index
    %c0_10 = arith.constant 0 : index
    %14 = vector.load %arg3[%c1_8, %c0_9, %c0_10] : memref<27x8x64xf32, #tpu.memory_space<vmem>>, vector<1x8x64xf32>
    %15 = vector.shape_cast %14 : vector<1x8x64xf32> to vector<8x64xf32>
    %c0_11 = arith.constant 0 : index
    %c1_12 = arith.constant 1 : index
    %16 = memref.load %arg1[%c0_11, %c1_12] : memref<2x27xf32, #tpu.memory_space<smem>>
    %17 = vector.broadcast %16 : f32 to vector<8x64xf32>
    %18 = arith.mulf %15, %17 : vector<8x64xf32>
    %19 = arith.addf %1, %18 : vector<8x64xf32>
    %c1_13 = arith.constant 1 : index
    %c1_14 = arith.constant 1 : index
    %20 = memref.load %arg1[%c1_13, %c1_14] : memref<2x27xf32, #tpu.memory_space<smem>>
    %21 = vector.broadcast %20 : f32 to vector<8x64xf32>
    %22 = arith.mulf %15, %21 : vector<8x64xf32>
    %23 = arith.addf %3, %22 : vector<8x64xf32>
    %c2 = arith.constant 2 : index
    %c0_15 = arith.constant 0 : index
    %c0_16 = arith.constant 0 : index
    %24 = vector.load %arg3[%c2, %c0_15, %c0_16] : memref<27x8x64xf32, #tpu.memory_space<vmem>>, vector<1x8x64xf32>
    %25 = vector.shape_cast %24 : vector<1x8x64xf32> to vector<8x64xf32>
    %c0_17 = arith.constant 0 : index
    %c2_18 = arith.constant 2 : index
    %26 = memref.load %arg1[%c0_17, %c2_18] : memref<2x27xf32, #tpu.memory_space<smem>>
    %27 = vector.broadcast %26 : f32 to vector<8x64xf32>
    %28 = arith.mulf %25, %27 : vector<8x64xf32>
    %29 = arith.addf %9, %28 : vector<8x64xf32>
    %c1_19 = arith.constant 1 : index
    %c2_20 = arith.constant 2 : index
    %30 = memref.load %arg1[%c1_19, %c2_20] : memref<2x27xf32, #tpu.memory_space<smem>>
    %31 = vector.broadcast %30 : f32 to vector<8x64xf32>
    %32 = arith.mulf %25, %31 : vector<8x64xf32>
    %33 = arith.addf %13, %32 : vector<8x64xf32>
    %c3 = arith.constant 3 : index
    %c0_21 = arith.constant 0 : index
    %c0_22 = arith.constant 0 : index
    %34 = vector.load %arg3[%c3, %c0_21, %c0_22] : memref<27x8x64xf32, #tpu.memory_space<vmem>>, vector<1x8x64xf32>
    %35 = vector.shape_cast %34 : vector<1x8x64xf32> to vector<8x64xf32>
    %c0_23 = arith.constant 0 : index
    %c3_24 = arith.constant 3 : index
    %36 = memref.load %arg1[%c0_23, %c3_24] : memref<2x27xf32, #tpu.memory_space<smem>>
    %37 = vector.broadcast %36 : f32 to vector<8x64xf32>
    %38 = arith.mulf %35, %37 : vector<8x64xf32>
    %39 = arith.addf %19, %38 : vector<8x64xf32>
    %c1_25 = arith.constant 1 : index
    %c3_26 = arith.constant 3 : index
    %40 = memref.load %arg1[%c1_25, %c3_26] : memref<2x27xf32, #tpu.memory_space<smem>>
    %41 = vector.broadcast %40 : f32 to vector<8x64xf32>
    %42 = arith.mulf %35, %41 : vector<8x64xf32>
    %43 = arith.addf %23, %42 : vector<8x64xf32>
    %c4 = arith.constant 4 : index
    %c0_27 = arith.constant 0 : index
    %c0_28 = arith.constant 0 : index
    %44 = vector.load %arg3[%c4, %c0_27, %c0_28] : memref<27x8x64xf32, #tpu.memory_space<vmem>>, vector<1x8x64xf32>
    %45 = vector.shape_cast %44 : vector<1x8x64xf32> to vector<8x64xf32>
    %c0_29 = arith.constant 0 : index
    %c4_30 = arith.constant 4 : index
    %46 = memref.load %arg1[%c0_29, %c4_30] : memref<2x27xf32, #tpu.memory_space<smem>>
    %47 = vector.broadcast %46 : f32 to vector<8x64xf32>
    %48 = arith.mulf %45, %47 : vector<8x64xf32>
    %49 = arith.addf %29, %48 : vector<8x64xf32>
    %c1_31 = arith.constant 1 : index
    %c4_32 = arith.constant 4 : index
    %50 = memref.load %arg1[%c1_31, %c4_32] : memref<2x27xf32, #tpu.memory_space<smem>>
    %51 = vector.broadcast %50 : f32 to vector<8x64xf32>
    %52 = arith.mulf %45, %51 : vector<8x64xf32>
    %53 = arith.addf %33, %52 : vector<8x64xf32>
    %c5 = arith.constant 5 : index
    %c0_33 = arith.constant 0 : index
    %c0_34 = arith.constant 0 : index
    %54 = vector.load %arg3[%c5, %c0_33, %c0_34] : memref<27x8x64xf32, #tpu.memory_space<vmem>>, vector<1x8x64xf32>
    %55 = vector.shape_cast %54 : vector<1x8x64xf32> to vector<8x64xf32>
    %c0_35 = arith.constant 0 : index
    %c5_36 = arith.constant 5 : index
    %56 = memref.load %arg1[%c0_35, %c5_36] : memref<2x27xf32, #tpu.memory_space<smem>>
    %57 = vector.broadcast %56 : f32 to vector<8x64xf32>
    %58 = arith.mulf %55, %57 : vector<8x64xf32>
    %59 = arith.addf %39, %58 : vector<8x64xf32>
    %c1_37 = arith.constant 1 : index
    %c5_38 = arith.constant 5 : index
    %60 = memref.load %arg1[%c1_37, %c5_38] : memref<2x27xf32, #tpu.memory_space<smem>>
    %61 = vector.broadcast %60 : f32 to vector<8x64xf32>
    %62 = arith.mulf %55, %61 : vector<8x64xf32>
    %63 = arith.addf %43, %62 : vector<8x64xf32>
    %c6 = arith.constant 6 : index
    %c0_39 = arith.constant 0 : index
    %c0_40 = arith.constant 0 : index
    %64 = vector.load %arg3[%c6, %c0_39, %c0_40] : memref<27x8x64xf32, #tpu.memory_space<vmem>>, vector<1x8x64xf32>
    %65 = vector.shape_cast %64 : vector<1x8x64xf32> to vector<8x64xf32>
    %c0_41 = arith.constant 0 : index
    %c6_42 = arith.constant 6 : index
    %66 = memref.load %arg1[%c0_41, %c6_42] : memref<2x27xf32, #tpu.memory_space<smem>>
    %67 = vector.broadcast %66 : f32 to vector<8x64xf32>
    %68 = arith.mulf %65, %67 : vector<8x64xf32>
    %69 = arith.addf %49, %68 : vector<8x64xf32>
    %c1_43 = arith.constant 1 : index
    %c6_44 = arith.constant 6 : index
    %70 = memref.load %arg1[%c1_43, %c6_44] : memref<2x27xf32, #tpu.memory_space<smem>>
    %71 = vector.broadcast %70 : f32 to vector<8x64xf32>
    %72 = arith.mulf %65, %71 : vector<8x64xf32>
    %73 = arith.addf %53, %72 : vector<8x64xf32>
    %c7 = arith.constant 7 : index
    %c0_45 = arith.constant 0 : index
    %c0_46 = arith.constant 0 : index
    %74 = vector.load %arg3[%c7, %c0_45, %c0_46] : memref<27x8x64xf32, #tpu.memory_space<vmem>>, vector<1x8x64xf32>
    %75 = vector.shape_cast %74 : vector<1x8x64xf32> to vector<8x64xf32>
    %c0_47 = arith.constant 0 : index
    %c7_48 = arith.constant 7 : index
    %76 = memref.load %arg1[%c0_47, %c7_48] : memref<2x27xf32, #tpu.memory_space<smem>>
    %77 = vector.broadcast %76 : f32 to vector<8x64xf32>
    %78 = arith.mulf %75, %77 : vector<8x64xf32>
    %79 = arith.addf %59, %78 : vector<8x64xf32>
    %c1_49 = arith.constant 1 : index
    %c7_50 = arith.constant 7 : index
    %80 = memref.load %arg1[%c1_49, %c7_50] : memref<2x27xf32, #tpu.memory_space<smem>>
    %81 = vector.broadcast %80 : f32 to vector<8x64xf32>
    %82 = arith.mulf %75, %81 : vector<8x64xf32>
    %83 = arith.addf %63, %82 : vector<8x64xf32>
    %c8 = arith.constant 8 : index
    %c0_51 = arith.constant 0 : index
    %c0_52 = arith.constant 0 : index
    %84 = vector.load %arg3[%c8, %c0_51, %c0_52] : memref<27x8x64xf32, #tpu.memory_space<vmem>>, vector<1x8x64xf32>
    %85 = vector.shape_cast %84 : vector<1x8x64xf32> to vector<8x64xf32>
    %c0_53 = arith.constant 0 : index
    %c8_54 = arith.constant 8 : index
    %86 = memref.load %arg1[%c0_53, %c8_54] : memref<2x27xf32, #tpu.memory_space<smem>>
    %87 = vector.broadcast %86 : f32 to vector<8x64xf32>
    %88 = arith.mulf %85, %87 : vector<8x64xf32>
    %89 = arith.addf %69, %88 : vector<8x64xf32>
    %c1_55 = arith.constant 1 : index
    %c8_56 = arith.constant 8 : index
    %90 = memref.load %arg1[%c1_55, %c8_56] : memref<2x27xf32, #tpu.memory_space<smem>>
    %91 = vector.broadcast %90 : f32 to vector<8x64xf32>
    %92 = arith.mulf %85, %91 : vector<8x64xf32>
    %93 = arith.addf %73, %92 : vector<8x64xf32>
    %c9 = arith.constant 9 : index
    %c0_57 = arith.constant 0 : index
    %c0_58 = arith.constant 0 : index
    %94 = vector.load %arg3[%c9, %c0_57, %c0_58] : memref<27x8x64xf32, #tpu.memory_space<vmem>>, vector<1x8x64xf32>
    %95 = vector.shape_cast %94 : vector<1x8x64xf32> to vector<8x64xf32>
    %c0_59 = arith.constant 0 : index
    %c9_60 = arith.constant 9 : index
    %96 = memref.load %arg1[%c0_59, %c9_60] : memref<2x27xf32, #tpu.memory_space<smem>>
    %97 = vector.broadcast %96 : f32 to vector<8x64xf32>
    %98 = arith.mulf %95, %97 : vector<8x64xf32>
    %99 = arith.addf %79, %98 : vector<8x64xf32>
    %c1_61 = arith.constant 1 : index
    %c9_62 = arith.constant 9 : index
    %100 = memref.load %arg1[%c1_61, %c9_62] : memref<2x27xf32, #tpu.memory_space<smem>>
    %101 = vector.broadcast %100 : f32 to vector<8x64xf32>
    %102 = arith.mulf %95, %101 : vector<8x64xf32>
    %103 = arith.addf %83, %102 : vector<8x64xf32>
    %c10 = arith.constant 10 : index
    %c0_63 = arith.constant 0 : index
    %c0_64 = arith.constant 0 : index
    %104 = vector.load %arg3[%c10, %c0_63, %c0_64] : memref<27x8x64xf32, #tpu.memory_space<vmem>>, vector<1x8x64xf32>
    %105 = vector.shape_cast %104 : vector<1x8x64xf32> to vector<8x64xf32>
    %c0_65 = arith.constant 0 : index
    %c10_66 = arith.constant 10 : index
    %106 = memref.load %arg1[%c0_65, %c10_66] : memref<2x27xf32, #tpu.memory_space<smem>>
    %107 = vector.broadcast %106 : f32 to vector<8x64xf32>
    %108 = arith.mulf %105, %107 : vector<8x64xf32>
    %109 = arith.addf %89, %108 : vector<8x64xf32>
    %c1_67 = arith.constant 1 : index
    %c10_68 = arith.constant 10 : index
    %110 = memref.load %arg1[%c1_67, %c10_68] : memref<2x27xf32, #tpu.memory_space<smem>>
    %111 = vector.broadcast %110 : f32 to vector<8x64xf32>
    %112 = arith.mulf %105, %111 : vector<8x64xf32>
    %113 = arith.addf %93, %112 : vector<8x64xf32>
    %c11 = arith.constant 11 : index
    %c0_69 = arith.constant 0 : index
    %c0_70 = arith.constant 0 : index
    %114 = vector.load %arg3[%c11, %c0_69, %c0_70] : memref<27x8x64xf32, #tpu.memory_space<vmem>>, vector<1x8x64xf32>
    %115 = vector.shape_cast %114 : vector<1x8x64xf32> to vector<8x64xf32>
    %c0_71 = arith.constant 0 : index
    %c11_72 = arith.constant 11 : index
    %116 = memref.load %arg1[%c0_71, %c11_72] : memref<2x27xf32, #tpu.memory_space<smem>>
    %117 = vector.broadcast %116 : f32 to vector<8x64xf32>
    %118 = arith.mulf %115, %117 : vector<8x64xf32>
    %119 = arith.addf %99, %118 : vector<8x64xf32>
    %c1_73 = arith.constant 1 : index
    %c11_74 = arith.constant 11 : index
    %120 = memref.load %arg1[%c1_73, %c11_74] : memref<2x27xf32, #tpu.memory_space<smem>>
    %121 = vector.broadcast %120 : f32 to vector<8x64xf32>
    %122 = arith.mulf %115, %121 : vector<8x64xf32>
    %123 = arith.addf %103, %122 : vector<8x64xf32>
    %c12 = arith.constant 12 : index
    %c0_75 = arith.constant 0 : index
    %c0_76 = arith.constant 0 : index
    %124 = vector.load %arg3[%c12, %c0_75, %c0_76] : memref<27x8x64xf32, #tpu.memory_space<vmem>>, vector<1x8x64xf32>
    %125 = vector.shape_cast %124 : vector<1x8x64xf32> to vector<8x64xf32>
    %c0_77 = arith.constant 0 : index
    %c12_78 = arith.constant 12 : index
    %126 = memref.load %arg1[%c0_77, %c12_78] : memref<2x27xf32, #tpu.memory_space<smem>>
    %127 = vector.broadcast %126 : f32 to vector<8x64xf32>
    %128 = arith.mulf %125, %127 : vector<8x64xf32>
    %129 = arith.addf %109, %128 : vector<8x64xf32>
    %c1_79 = arith.constant 1 : index
    %c12_80 = arith.constant 12 : index
    %130 = memref.load %arg1[%c1_79, %c12_80] : memref<2x27xf32, #tpu.memory_space<smem>>
    %131 = vector.broadcast %130 : f32 to vector<8x64xf32>
    %132 = arith.mulf %125, %131 : vector<8x64xf32>
    %133 = arith.addf %113, %132 : vector<8x64xf32>
    %c13 = arith.constant 13 : index
    %c0_81 = arith.constant 0 : index
    %c0_82 = arith.constant 0 : index
    %134 = vector.load %arg3[%c13, %c0_81, %c0_82] : memref<27x8x64xf32, #tpu.memory_space<vmem>>, vector<1x8x64xf32>
    %135 = vector.shape_cast %134 : vector<1x8x64xf32> to vector<8x64xf32>
    %c0_83 = arith.constant 0 : index
    %c13_84 = arith.constant 13 : index
    %136 = memref.load %arg1[%c0_83, %c13_84] : memref<2x27xf32, #tpu.memory_space<smem>>
    %137 = vector.broadcast %136 : f32 to vector<8x64xf32>
    %138 = arith.mulf %135, %137 : vector<8x64xf32>
    %139 = arith.addf %119, %138 : vector<8x64xf32>
    %c1_85 = arith.constant 1 : index
    %c13_86 = arith.constant 13 : index
    %140 = memref.load %arg1[%c1_85, %c13_86] : memref<2x27xf32, #tpu.memory_space<smem>>
    %141 = vector.broadcast %140 : f32 to vector<8x64xf32>
    %142 = arith.mulf %135, %141 : vector<8x64xf32>
    %143 = arith.addf %123, %142 : vector<8x64xf32>
    %c14 = arith.constant 14 : index
    %c0_87 = arith.constant 0 : index
    %c0_88 = arith.constant 0 : index
    %144 = vector.load %arg3[%c14, %c0_87, %c0_88] : memref<27x8x64xf32, #tpu.memory_space<vmem>>, vector<1x8x64xf32>
    %145 = vector.shape_cast %144 : vector<1x8x64xf32> to vector<8x64xf32>
    %c0_89 = arith.constant 0 : index
    %c14_90 = arith.constant 14 : index
    %146 = memref.load %arg1[%c0_89, %c14_90] : memref<2x27xf32, #tpu.memory_space<smem>>
    %147 = vector.broadcast %146 : f32 to vector<8x64xf32>
    %148 = arith.mulf %145, %147 : vector<8x64xf32>
    %149 = arith.addf %129, %148 : vector<8x64xf32>
    %c1_91 = arith.constant 1 : index
    %c14_92 = arith.constant 14 : index
    %150 = memref.load %arg1[%c1_91, %c14_92] : memref<2x27xf32, #tpu.memory_space<smem>>
    %151 = vector.broadcast %150 : f32 to vector<8x64xf32>
    %152 = arith.mulf %145, %151 : vector<8x64xf32>
    %153 = arith.addf %133, %152 : vector<8x64xf32>
    %c15 = arith.constant 15 : index
    %c0_93 = arith.constant 0 : index
    %c0_94 = arith.constant 0 : index
    %154 = vector.load %arg3[%c15, %c0_93, %c0_94] : memref<27x8x64xf32, #tpu.memory_space<vmem>>, vector<1x8x64xf32>
    %155 = vector.shape_cast %154 : vector<1x8x64xf32> to vector<8x64xf32>
    %c0_95 = arith.constant 0 : index
    %c15_96 = arith.constant 15 : index
    %156 = memref.load %arg1[%c0_95, %c15_96] : memref<2x27xf32, #tpu.memory_space<smem>>
    %157 = vector.broadcast %156 : f32 to vector<8x64xf32>
    %158 = arith.mulf %155, %157 : vector<8x64xf32>
    %159 = arith.addf %139, %158 : vector<8x64xf32>
    %c1_97 = arith.constant 1 : index
    %c15_98 = arith.constant 15 : index
    %160 = memref.load %arg1[%c1_97, %c15_98] : memref<2x27xf32, #tpu.memory_space<smem>>
    %161 = vector.broadcast %160 : f32 to vector<8x64xf32>
    %162 = arith.mulf %155, %161 : vector<8x64xf32>
    %163 = arith.addf %143, %162 : vector<8x64xf32>
    %c16 = arith.constant 16 : index
    %c0_99 = arith.constant 0 : index
    %c0_100 = arith.constant 0 : index
    %164 = vector.load %arg3[%c16, %c0_99, %c0_100] : memref<27x8x64xf32, #tpu.memory_space<vmem>>, vector<1x8x64xf32>
    %165 = vector.shape_cast %164 : vector<1x8x64xf32> to vector<8x64xf32>
    %c0_101 = arith.constant 0 : index
    %c16_102 = arith.constant 16 : index
    %166 = memref.load %arg1[%c0_101, %c16_102] : memref<2x27xf32, #tpu.memory_space<smem>>
    %167 = vector.broadcast %166 : f32 to vector<8x64xf32>
    %168 = arith.mulf %165, %167 : vector<8x64xf32>
    %169 = arith.addf %149, %168 : vector<8x64xf32>
    %c1_103 = arith.constant 1 : index
    %c16_104 = arith.constant 16 : index
    %170 = memref.load %arg1[%c1_103, %c16_104] : memref<2x27xf32, #tpu.memory_space<smem>>
    %171 = vector.broadcast %170 : f32 to vector<8x64xf32>
    %172 = arith.mulf %165, %171 : vector<8x64xf32>
    %173 = arith.addf %153, %172 : vector<8x64xf32>
    %c17 = arith.constant 17 : index
    %c0_105 = arith.constant 0 : index
    %c0_106 = arith.constant 0 : index
    %174 = vector.load %arg3[%c17, %c0_105, %c0_106] : memref<27x8x64xf32, #tpu.memory_space<vmem>>, vector<1x8x64xf32>
    %175 = vector.shape_cast %174 : vector<1x8x64xf32> to vector<8x64xf32>
    %c0_107 = arith.constant 0 : index
    %c17_108 = arith.constant 17 : index
    %176 = memref.load %arg1[%c0_107, %c17_108] : memref<2x27xf32, #tpu.memory_space<smem>>
    %177 = vector.broadcast %176 : f32 to vector<8x64xf32>
    %178 = arith.mulf %175, %177 : vector<8x64xf32>
    %179 = arith.addf %159, %178 : vector<8x64xf32>
    %c1_109 = arith.constant 1 : index
    %c17_110 = arith.constant 17 : index
    %180 = memref.load %arg1[%c1_109, %c17_110] : memref<2x27xf32, #tpu.memory_space<smem>>
    %181 = vector.broadcast %180 : f32 to vector<8x64xf32>
    %182 = arith.mulf %175, %181 : vector<8x64xf32>
    %183 = arith.addf %163, %182 : vector<8x64xf32>
    %c18 = arith.constant 18 : index
    %c0_111 = arith.constant 0 : index
    %c0_112 = arith.constant 0 : index
    %184 = vector.load %arg3[%c18, %c0_111, %c0_112] : memref<27x8x64xf32, #tpu.memory_space<vmem>>, vector<1x8x64xf32>
    %185 = vector.shape_cast %184 : vector<1x8x64xf32> to vector<8x64xf32>
    %c0_113 = arith.constant 0 : index
    %c18_114 = arith.constant 18 : index
    %186 = memref.load %arg1[%c0_113, %c18_114] : memref<2x27xf32, #tpu.memory_space<smem>>
    %187 = vector.broadcast %186 : f32 to vector<8x64xf32>
    %188 = arith.mulf %185, %187 : vector<8x64xf32>
    %189 = arith.addf %169, %188 : vector<8x64xf32>
    %c1_115 = arith.constant 1 : index
    %c18_116 = arith.constant 18 : index
    %190 = memref.load %arg1[%c1_115, %c18_116] : memref<2x27xf32, #tpu.memory_space<smem>>
    %191 = vector.broadcast %190 : f32 to vector<8x64xf32>
    %192 = arith.mulf %185, %191 : vector<8x64xf32>
    %193 = arith.addf %173, %192 : vector<8x64xf32>
    %c19 = arith.constant 19 : index
    %c0_117 = arith.constant 0 : index
    %c0_118 = arith.constant 0 : index
    %194 = vector.load %arg3[%c19, %c0_117, %c0_118] : memref<27x8x64xf32, #tpu.memory_space<vmem>>, vector<1x8x64xf32>
    %195 = vector.shape_cast %194 : vector<1x8x64xf32> to vector<8x64xf32>
    %c0_119 = arith.constant 0 : index
    %c19_120 = arith.constant 19 : index
    %196 = memref.load %arg1[%c0_119, %c19_120] : memref<2x27xf32, #tpu.memory_space<smem>>
    %197 = vector.broadcast %196 : f32 to vector<8x64xf32>
    %198 = arith.mulf %195, %197 : vector<8x64xf32>
    %199 = arith.addf %179, %198 : vector<8x64xf32>
    %c1_121 = arith.constant 1 : index
    %c19_122 = arith.constant 19 : index
    %200 = memref.load %arg1[%c1_121, %c19_122] : memref<2x27xf32, #tpu.memory_space<smem>>
    %201 = vector.broadcast %200 : f32 to vector<8x64xf32>
    %202 = arith.mulf %195, %201 : vector<8x64xf32>
    %203 = arith.addf %183, %202 : vector<8x64xf32>
    %c20 = arith.constant 20 : index
    %c0_123 = arith.constant 0 : index
    %c0_124 = arith.constant 0 : index
    %204 = vector.load %arg3[%c20, %c0_123, %c0_124] : memref<27x8x64xf32, #tpu.memory_space<vmem>>, vector<1x8x64xf32>
    %205 = vector.shape_cast %204 : vector<1x8x64xf32> to vector<8x64xf32>
    %c0_125 = arith.constant 0 : index
    %c20_126 = arith.constant 20 : index
    %206 = memref.load %arg1[%c0_125, %c20_126] : memref<2x27xf32, #tpu.memory_space<smem>>
    %207 = vector.broadcast %206 : f32 to vector<8x64xf32>
    %208 = arith.mulf %205, %207 : vector<8x64xf32>
    %209 = arith.addf %189, %208 : vector<8x64xf32>
    %c1_127 = arith.constant 1 : index
    %c20_128 = arith.constant 20 : index
    %210 = memref.load %arg1[%c1_127, %c20_128] : memref<2x27xf32, #tpu.memory_space<smem>>
    %211 = vector.broadcast %210 : f32 to vector<8x64xf32>
    %212 = arith.mulf %205, %211 : vector<8x64xf32>
    %213 = arith.addf %193, %212 : vector<8x64xf32>
    %c21 = arith.constant 21 : index
    %c0_129 = arith.constant 0 : index
    %c0_130 = arith.constant 0 : index
    %214 = vector.load %arg3[%c21, %c0_129, %c0_130] : memref<27x8x64xf32, #tpu.memory_space<vmem>>, vector<1x8x64xf32>
    %215 = vector.shape_cast %214 : vector<1x8x64xf32> to vector<8x64xf32>
    %c0_131 = arith.constant 0 : index
    %c21_132 = arith.constant 21 : index
    %216 = memref.load %arg1[%c0_131, %c21_132] : memref<2x27xf32, #tpu.memory_space<smem>>
    %217 = vector.broadcast %216 : f32 to vector<8x64xf32>
    %218 = arith.mulf %215, %217 : vector<8x64xf32>
    %219 = arith.addf %199, %218 : vector<8x64xf32>
    %c1_133 = arith.constant 1 : index
    %c21_134 = arith.constant 21 : index
    %220 = memref.load %arg1[%c1_133, %c21_134] : memref<2x27xf32, #tpu.memory_space<smem>>
    %221 = vector.broadcast %220 : f32 to vector<8x64xf32>
    %222 = arith.mulf %215, %221 : vector<8x64xf32>
    %223 = arith.addf %203, %222 : vector<8x64xf32>
    %c22 = arith.constant 22 : index
    %c0_135 = arith.constant 0 : index
    %c0_136 = arith.constant 0 : index
    %224 = vector.load %arg3[%c22, %c0_135, %c0_136] : memref<27x8x64xf32, #tpu.memory_space<vmem>>, vector<1x8x64xf32>
    %225 = vector.shape_cast %224 : vector<1x8x64xf32> to vector<8x64xf32>
    %c0_137 = arith.constant 0 : index
    %c22_138 = arith.constant 22 : index
    %226 = memref.load %arg1[%c0_137, %c22_138] : memref<2x27xf32, #tpu.memory_space<smem>>
    %227 = vector.broadcast %226 : f32 to vector<8x64xf32>
    %228 = arith.mulf %225, %227 : vector<8x64xf32>
    %229 = arith.addf %209, %228 : vector<8x64xf32>
    %c1_139 = arith.constant 1 : index
    %c22_140 = arith.constant 22 : index
    %230 = memref.load %arg1[%c1_139, %c22_140] : memref<2x27xf32, #tpu.memory_space<smem>>
    %231 = vector.broadcast %230 : f32 to vector<8x64xf32>
    %232 = arith.mulf %225, %231 : vector<8x64xf32>
    %233 = arith.addf %213, %232 : vector<8x64xf32>
    %c23 = arith.constant 23 : index
    %c0_141 = arith.constant 0 : index
    %c0_142 = arith.constant 0 : index
    %234 = vector.load %arg3[%c23, %c0_141, %c0_142] : memref<27x8x64xf32, #tpu.memory_space<vmem>>, vector<1x8x64xf32>
    %235 = vector.shape_cast %234 : vector<1x8x64xf32> to vector<8x64xf32>
    %c0_143 = arith.constant 0 : index
    %c23_144 = arith.constant 23 : index
    %236 = memref.load %arg1[%c0_143, %c23_144] : memref<2x27xf32, #tpu.memory_space<smem>>
    %237 = vector.broadcast %236 : f32 to vector<8x64xf32>
    %238 = arith.mulf %235, %237 : vector<8x64xf32>
    %239 = arith.addf %219, %238 : vector<8x64xf32>
    %c1_145 = arith.constant 1 : index
    %c23_146 = arith.constant 23 : index
    %240 = memref.load %arg1[%c1_145, %c23_146] : memref<2x27xf32, #tpu.memory_space<smem>>
    %241 = vector.broadcast %240 : f32 to vector<8x64xf32>
    %242 = arith.mulf %235, %241 : vector<8x64xf32>
    %243 = arith.addf %223, %242 : vector<8x64xf32>
    %c24 = arith.constant 24 : index
    %c0_147 = arith.constant 0 : index
    %c0_148 = arith.constant 0 : index
    %244 = vector.load %arg3[%c24, %c0_147, %c0_148] : memref<27x8x64xf32, #tpu.memory_space<vmem>>, vector<1x8x64xf32>
    %245 = vector.shape_cast %244 : vector<1x8x64xf32> to vector<8x64xf32>
    %c0_149 = arith.constant 0 : index
    %c24_150 = arith.constant 24 : index
    %246 = memref.load %arg1[%c0_149, %c24_150] : memref<2x27xf32, #tpu.memory_space<smem>>
    %247 = vector.broadcast %246 : f32 to vector<8x64xf32>
    %248 = arith.mulf %245, %247 : vector<8x64xf32>
    %249 = arith.addf %229, %248 : vector<8x64xf32>
    %c1_151 = arith.constant 1 : index
    %c24_152 = arith.constant 24 : index
    %250 = memref.load %arg1[%c1_151, %c24_152] : memref<2x27xf32, #tpu.memory_space<smem>>
    %251 = vector.broadcast %250 : f32 to vector<8x64xf32>
    %252 = arith.mulf %245, %251 : vector<8x64xf32>
    %253 = arith.addf %233, %252 : vector<8x64xf32>
    %c25 = arith.constant 25 : index
    %c0_153 = arith.constant 0 : index
    %c0_154 = arith.constant 0 : index
    %254 = vector.load %arg3[%c25, %c0_153, %c0_154] : memref<27x8x64xf32, #tpu.memory_space<vmem>>, vector<1x8x64xf32>
    %255 = vector.shape_cast %254 : vector<1x8x64xf32> to vector<8x64xf32>
    %c0_155 = arith.constant 0 : index
    %c25_156 = arith.constant 25 : index
    %256 = memref.load %arg1[%c0_155, %c25_156] : memref<2x27xf32, #tpu.memory_space<smem>>
    %257 = vector.broadcast %256 : f32 to vector<8x64xf32>
    %258 = arith.mulf %255, %257 : vector<8x64xf32>
    %259 = arith.addf %239, %258 : vector<8x64xf32>
    %c1_157 = arith.constant 1 : index
    %c25_158 = arith.constant 25 : index
    %260 = memref.load %arg1[%c1_157, %c25_158] : memref<2x27xf32, #tpu.memory_space<smem>>
    %261 = vector.broadcast %260 : f32 to vector<8x64xf32>
    %262 = arith.mulf %255, %261 : vector<8x64xf32>
    %263 = arith.addf %243, %262 : vector<8x64xf32>
    %c26 = arith.constant 26 : index
    %c0_159 = arith.constant 0 : index
    %c0_160 = arith.constant 0 : index
    %264 = vector.load %arg3[%c26, %c0_159, %c0_160] : memref<27x8x64xf32, #tpu.memory_space<vmem>>, vector<1x8x64xf32>
    %265 = vector.shape_cast %264 : vector<1x8x64xf32> to vector<8x64xf32>
    %c0_161 = arith.constant 0 : index
    %c26_162 = arith.constant 26 : index
    %266 = memref.load %arg1[%c0_161, %c26_162] : memref<2x27xf32, #tpu.memory_space<smem>>
    %267 = vector.broadcast %266 : f32 to vector<8x64xf32>
    %268 = arith.mulf %265, %267 : vector<8x64xf32>
    %269 = arith.addf %249, %268 : vector<8x64xf32>
    %c1_163 = arith.constant 1 : index
    %c26_164 = arith.constant 26 : index
    %270 = memref.load %arg1[%c1_163, %c26_164] : memref<2x27xf32, #tpu.memory_space<smem>>
    %271 = vector.broadcast %270 : f32 to vector<8x64xf32>
    %272 = arith.mulf %265, %271 : vector<8x64xf32>
    %273 = arith.addf %253, %272 : vector<8x64xf32>
    %c0_165 = arith.constant 0 : index
    %c0_166 = arith.constant 0 : index
    %274 = vector.load %arg5[%c0_165, %c0_166] : memref<1x32xf32, #tpu.memory_space<vmem>>, vector<1x32xf32>
    %275 = arith.addf %269, %259 : vector<8x64xf32>
    %c0_167 = arith.constant 0 : index
    %276 = memref.load %arg2[%c0_167] : memref<2xf32, #tpu.memory_space<smem>>
    %277 = vector.broadcast %276 : f32 to vector<8x64xf32>
    %278 = arith.addf %275, %277 : vector<8x64xf32>
    %cst_168 = arith.constant 0.000000e+00 : f32
    %279 = vector.broadcast %cst_168 : f32 to vector<8x64xf32>
    %280 = arith.cmpf oge, %278, %279 : vector<8x64xf32>
    %cst_169 = arith.constant 0.00999999977 : f32
    %281 = vector.broadcast %cst_169 : f32 to vector<8x64xf32>
    %282 = arith.mulf %281, %278 : vector<8x64xf32>
    %283 = arith.select %280, %278, %282 : vector<8x64xi1>, vector<8x64xf32>
    %284 = vector.shape_cast %283 : vector<8x64xf32> to vector<1x8x64xf32>
    %cst_170 = arith.constant dense<0xFF800000> : vector<1x64xf32>
    %285 = vector.multi_reduction <maximumf>, %284, %cst_170 [1] : vector<1x8x64xf32> to vector<1x64xf32>
    %c0_171 = arith.constant 0 : index
    %c0_172 = arith.constant 0 : index
    %c0_173 = arith.constant 0 : index
    %286 = vector.load %arg4[%c0_171, %c0_172, %c0_173] : memref<2x64x32xf32, #tpu.memory_space<vmem>>, vector<1x64x32xf32>
    %287 = vector.shape_cast %286 : vector<1x64x32xf32> to vector<64x32xf32>
    %cst_174 = arith.constant dense<0.000000e+00> : vector<1x32xf32>
    %288 = tpu.matmul %285, %287, %cst_174 {dimension_numbers = #tpu.dot_dimension_numbers<[1], [0], [0], [1], [0, 0, 1, 1], [], []>} : vector<1x64xf32>, vector<64x32xf32>, vector<1x32xf32> -> vector<1x32xf32>
    %289 = arith.addf %274, %288 : vector<1x32xf32>
    %290 = arith.addf %273, %263 : vector<8x64xf32>
    %c1_175 = arith.constant 1 : index
    %291 = memref.load %arg2[%c1_175] : memref<2xf32, #tpu.memory_space<smem>>
    %292 = vector.broadcast %291 : f32 to vector<8x64xf32>
    %293 = arith.addf %290, %292 : vector<8x64xf32>
    %cst_176 = arith.constant 0.000000e+00 : f32
    %294 = vector.broadcast %cst_176 : f32 to vector<8x64xf32>
    %295 = arith.cmpf oge, %293, %294 : vector<8x64xf32>
    %cst_177 = arith.constant 0.00999999977 : f32
    %296 = vector.broadcast %cst_177 : f32 to vector<8x64xf32>
    %297 = arith.mulf %296, %293 : vector<8x64xf32>
    %298 = arith.select %295, %293, %297 : vector<8x64xi1>, vector<8x64xf32>
    %299 = vector.shape_cast %298 : vector<8x64xf32> to vector<1x8x64xf32>
    %cst_178 = arith.constant dense<0xFF800000> : vector<1x64xf32>
    %300 = vector.multi_reduction <maximumf>, %299, %cst_178 [1] : vector<1x8x64xf32> to vector<1x64xf32>
    %c1_179 = arith.constant 1 : index
    %c0_180 = arith.constant 0 : index
    %c0_181 = arith.constant 0 : index
    %301 = vector.load %arg4[%c1_179, %c0_180, %c0_181] : memref<2x64x32xf32, #tpu.memory_space<vmem>>, vector<1x64x32xf32>
    %302 = vector.shape_cast %301 : vector<1x64x32xf32> to vector<64x32xf32>
    %cst_182 = arith.constant dense<0.000000e+00> : vector<1x32xf32>
    %303 = tpu.matmul %300, %302, %cst_182 {dimension_numbers = #tpu.dot_dimension_numbers<[1], [0], [0], [1], [0, 0, 1, 1], [], []>} : vector<1x64xf32>, vector<64x32xf32>, vector<1x32xf32> -> vector<1x32xf32>
    %304 = arith.addf %289, %303 : vector<1x32xf32>
    %cst_183 = arith.constant 0.000000e+00 : f32
    %305 = vector.broadcast %cst_183 : f32 to vector<1x32xf32>
    %306 = arith.cmpf oge, %304, %305 : vector<1x32xf32>
    %cst_184 = arith.constant 0.00999999977 : f32
    %307 = vector.broadcast %cst_184 : f32 to vector<1x32xf32>
    %308 = arith.mulf %307, %304 : vector<1x32xf32>
    %309 = arith.select %306, %304, %308 : vector<1x32xi1>, vector<1x32xf32>
    %c0_185 = arith.constant 0 : index
    %c0_186 = arith.constant 0 : index
    %310 = vector.load %arg6[%c0_185, %c0_186] : memref<1x32xf32, #tpu.memory_space<vmem>>, vector<1x32xf32>
    %311 = arith.mulf %309, %310 : vector<1x32xf32>
    %c0_187 = arith.constant 0 : index
    %c0_188 = arith.constant 0 : index
    %312 = vector.load %arg7[%c0_187, %c0_188] : memref<1x32xf32, #tpu.memory_space<vmem>>, vector<1x32xf32>
    %313 = arith.addf %311, %312 : vector<1x32xf32>
    %c0_189 = arith.constant 0 : index
    %c0_190 = arith.constant 0 : index
    %314 = vector.load %arg8[%c0_189, %c0_190] : memref<32x128xf32, #tpu.memory_space<vmem>>, vector<32x128xf32>
    %cst_191 = arith.constant dense<0.000000e+00> : vector<1x128xf32>
    %315 = tpu.matmul %313, %314, %cst_191 {dimension_numbers = #tpu.dot_dimension_numbers<[1], [0], [0], [1], [0, 0, 1, 1], [], []>} : vector<1x32xf32>, vector<32x128xf32>, vector<1x128xf32> -> vector<1x128xf32>
    %c0_192 = arith.constant 0 : index
    %c0_193 = arith.constant 0 : index
    %316 = vector.load %arg9[%c0_192, %c0_193] : memref<1x128xf32, #tpu.memory_space<vmem>>, vector<1x128xf32>
    %317 = arith.addf %315, %316 : vector<1x128xf32>
    %318 = vector.shape_cast %317 : vector<1x128xf32> to vector<1x1x128xf32>
    %c0_194 = arith.constant 0 : index
    %c0_195 = arith.constant 0 : index
    %c0_196 = arith.constant 0 : index
    %319 = vector.load %arg10[%c0_194, %c0_195, %c0_196] : memref<1x1x128xf32, #tpu.memory_space<vmem>>, vector<1x1x128xf32>
    tpu.vector_store %arg10[%c0_194, %c0_195, %c0_196], %318 {strides = array<i32>} : memref<1x1x128xf32, #tpu.memory_space<vmem>>, vector<1x1x128xf32>,
    return
  }
  func.func @transform_0(%arg0: i32) -> (i32, i32) {
    %c0_i32 = arith.constant 0 : i32
    %c0_i32_0 = arith.constant 0 : i32
    %c0_i32_1 = arith.constant 0 : i32
    return %c0_i32, %c0_i32_0 : i32, i32
  }
  func.func @transform_1(%arg0: i32) -> i32 {
    %c0_i32 = arith.constant 0 : i32
    %c0_i32_0 = arith.constant 0 : i32
    return %c0_i32 : i32
  }
  func.func @transform_2(%arg0: i32) -> (i32, i32, i32) {
    %c0_i32 = arith.constant 0 : i32
    %c0_i32_0 = arith.constant 0 : i32
    %c0_i32_1 = arith.constant 0 : i32
    return %c0_i32, %arg0, %c0_i32_0 : i32, i32, i32
  }
  func.func @transform_3(%arg0: i32) -> (i32, i32, i32) {
    %c0_i32 = arith.constant 0 : i32
    %c0_i32_0 = arith.constant 0 : i32
    %c0_i32_1 = arith.constant 0 : i32
    %c0_i32_2 = arith.constant 0 : i32
    return %c0_i32, %c0_i32_0, %c0_i32_1 : i32, i32, i32
  }
  func.func @transform_4(%arg0: i32) -> (i32, i32) {
    %c0_i32 = arith.constant 0 : i32
    %c0_i32_0 = arith.constant 0 : i32
    %c0_i32_1 = arith.constant 0 : i32
    return %c0_i32, %c0_i32_0 : i32, i32
  }
  func.func @transform_5(%arg0: i32) -> (i32, i32) {
    %c0_i32 = arith.constant 0 : i32
    %c0_i32_0 = arith.constant 0 : i32
    %c0_i32_1 = arith.constant 0 : i32
    return %c0_i32, %c0_i32_0 : i32, i32
  }
  func.func @transform_6(%arg0: i32) -> (i32, i32) {
    %c0_i32 = arith.constant 0 : i32
    %c0_i32_0 = arith.constant 0 : i32
    %c0_i32_1 = arith.constant 0 : i32
    return %c0_i32, %c0_i32_0 : i32, i32
  }
  func.func @transform_7(%arg0: i32) -> (i32, i32) {
    %c0_i32 = arith.constant 0 : i32
    %c0_i32_0 = arith.constant 0 : i32
    %c0_i32_1 = arith.constant 0 : i32
    return %c0_i32, %c0_i32_0 : i32, i32
  }
  func.func @transform_8(%arg0: i32) -> (i32, i32) {
    %c0_i32 = arith.constant 0 : i32
    %c0_i32_0 = arith.constant 0 : i32
    %c0_i32_1 = arith.constant 0 : i32
    return %c0_i32, %c0_i32_0 : i32, i32
  }
  func.func @transform_9(%arg0: i32) -> (i32, i32, i32) {
    %c0_i32 = arith.constant 0 : i32
    %c0_i32_0 = arith.constant 0 : i32
    %c0_i32_1 = arith.constant 0 : i32
    return %arg0, %c0_i32, %c0_i32_0 : i32, i32, i32
  }
}

</mosaic_0001>

<bundles_post_ra>
// kernel: nn_conv3d_simple_forward.1
= control target key start
LH: loop header
LB: loop body
LE: loop exit
PB: predicated region body
PF: predicated region fallthrough
CT: control target
= control target key end

     0   :  { %s2064_s0 = inlined_call_operand.vmem [shape: f32[2,27], index: 0, kind: input, shape index: {}]   ;;  %s2065_s1 = inlined_call_operand.vmem [shape: f32[2], index: 1, kind: input, shape index: {}]   ;;  %s2066_s2 = inlined_call_operand.vmem [shape: f32[27,16,64], index: 2, kind: input, shape index: {}]   ;;  %s2067_s3 = inlined_call_operand.vmem [shape: f32[2,64,32], index: 3, kind: input, shape index: {}]   ;;  %s2068_s4 = inlined_call_operand.vmem [shape: f32[1,32], index: 4, kind: input, shape index: {}]   ;;  %s2069_s5 = inlined_call_operand.vmem [shape: f32[1,32], index: 5, kind: input, shape index: {}]   ;;  %s2070_s6 = inlined_call_operand.vmem [shape: f32[1,32], index: 6, kind: input, shape index: {}]   ;;  %s2071_s7 = inlined_call_operand.vmem [shape: f32[32,128], index: 7, kind: input, shape index: {}]   ;;  %s2072_s8 = inlined_call_operand.vmem [shape: f32[1,128], index: 8, kind: input, shape index: {}]   ;;  %s2073_s9 = inlined_call_operand.hbm [shape: f32[2,1,128], index: 9, kind: output, shape index: {}]  }
   0x1   :  { %2077 = sst [smem:[#allocation13_spill]] %s2064_s0 }
   0x2   :  { %2078 = sst [smem:[#allocation14_spill]] %s2065_s1 }
   0x3   :  { %2079 = sst [smem:[#allocation15_spill]] %s2066_s2 }
   0x4   :  { %2080 = sst [smem:[#allocation16_spill]] %s2067_s3 }
   0x5   :  { %14 = vsyncpa [#allocation4], 0 }
   0x6   :  { %15 = vsyncpa [#allocation6], 0 }
   0x7   :  { %16 = vsyncpa [#allocation3], 0 }
   0x8   :  { %18 = vsyncpa [#allocation3 + $0x1], 0  ;;  %s1572_s30 = smov 0   ;;  %s1574_s10 = smov 0  }
   0x9   :  { %s1576_s11 = smov 0   ;;  %s1578_s12 = smov 0  }
   0xa LB: > { %s1593_s13 = sadd.s32 4294967295, %s1514_s12   ;;  %s1142_s14 = sadd.s32 4294967294, %s1514_s12   ;;  %s1514_s12 = sphi %s1578_s12, %s2103_s12   ;;  %s1510_s11 = sphi %s1576_s11, %s2102_s11   ;;  %s1506_s10 = sphi %s1574_s10, %s2101_s10   ;;  %s1502_s30 = sphi %s1572_s30, %s2100_s30  }
   0xb   : > { %s1597_s15 = sadd.s32 1, %s1514_s12   ;;  %s73_s16 = sadd.s32 1, %s1510_s11 }
   0xc   : > { %s70_s17 = ssub.s32 %s1514_s12, %s1597_s15  ;;  %p80_p0 = scmp.ne.s32.totalorder %s1510_s11, %s1506_s10 }
   0xd   : > { %p71_p1 = scmp.eq.s32.totalorder %s70_s17, 0  ;;  %p81_p2 = scmp.eq.s32.totalorder %s1514_s12, 0 }
   0xe   : > { %p236_p3 = scmp.eq.s32.totalorder %s1593_s13, 1  ;;  %p241_p4 = scmp.ne.s32.totalorder %s1506_s10, %s1502_s30 }
   0xf   : > { %s1609_s18 = scalar_select %p71_p1, %s1510_s11, %s73_s16  }
  0x10   : > { %p1611_p5 = por %p81_p2, %p80_p0  ;;  %p1615_p6 = por %p236_p3, %p80_p0 }
  0x11   : > { %2081 = sst [smem:[#allocation12_spill]] %s1609_s18  ;;  %p242_p7 = scmp.eq.s32.totalorder %s1142_s14, 1 }
  0x12   : > { %s2082_s19 = scalar_select %p1611_p5, 1, 0 }
  0x13   : > { %s2083_s20 = scalar_select %p1615_p6, 1, 0 }
  0x14   : > { %p1143_p8 = scmp.ge.s32.totalorder %s1514_s12, 1  ;;  %p249_p9 = scmp.lt.s32.totalorder %s1514_s12, 3 }
  0x15   : > { %p1621_p10 = por %p242_p7, %p241_p4  ;;  %p2074_p11 = scmp.eq.s32.totalorder %s1593_s13, 0 }
  0x16   : > { %p1626_p12 = pnand %p1143_p8, %p249_p9  ;;  %s2086_s0 = sld [smem:[#allocation13_spill]] }
  0x17   : > { %s2084_s21 = scalar_select %p1621_p10, 1, 0 }
  0x18   : > { %s2085_s22 = scalar_select %p1626_p12, 1, 0 }
  0x19   : > { %p1361_p13 = pneg %p1626_p12  ;;  %s2087_s1 = sld [smem:[#allocation14_spill]] }
  0x1b   : > { %p1640_p0 = pnand %p2074_p11, %p1361_p13 }
  0x1c   : > { %s262_s25 = sshll.u32 %s2086_s0, 4  ;;  %s263_s25 = int_to_ptr.vmem [resolvable:$true] %s262_s25 }
  0x1d   : > { %s1414_s14 = scalar_lea.vmem %s263_s25, 32  ;;  %p1416_p2 = pneg %p1640_p0 }
  0x1e   : > { %p1415_p1 = scmp.ne.s32.totalorder %s263_s25, %s1414_s14  ;;  %p1422_p7 = scmp.lt.s32.totalorder %s263_s25, %s263_s25 }
  0x1f   : > { %s273_s28 = sshll.u32 %s2087_s1, 4  ;;  %p1423_p8 = scmp.lt.s32.totalorder %s1414_s14, %s1414_s14  ;;  %s274_s28 = int_to_ptr.vmem [resolvable:$true] %s273_s28 }
  0x20   : > { %p1417_p3 = pnand %p1416_p2, %p1415_p1 }
  0x21   : > { %p1424_p9 = por %p1423_p8, %p1422_p7 }
  0x22   : > { %p1418_p4 = pneg %p1417_p3 }
  0x24   : > { %p1425_p10 = pnand %p1424_p9, %p1418_p4 }
  0x26   : > { %1428 = shalt.err (!%p1425_p10)
}
  0x27   : > { %s1516_s16 = smov [#allocation2]   ;;  %s1429_s17 = scalar_lea.vmem %s274_s28, 16 }
  0x28   : > { %1364 = dma.vmem_to_smem (!%p1640_p0), %s263_s25, 32, %s1516_s16, [#allocation4]  }
  0x29   : > { %p1430_p13 = scmp.ne.s32.totalorder %s274_s28, %s1429_s17  ;;  %p1437_p12 = scmp.lt.s32.totalorder %s274_s28, %s274_s28 }
  0x2a   : > { %p1438_p5 = scmp.lt.s32.totalorder %s1429_s17, %s1429_s17 }
  0x2b   : > { %p1432_p11 = pnand %p1430_p13, %p1416_p2 }
  0x2c   : > { %p1439_p1 = por %p1438_p5, %p1437_p12 }
  0x2d   : > { %p1433_p6 = pneg %p1432_p11 }
  0x2f   : > { %p1440_p3 = pnand %p1439_p1, %p1433_p6 }
  0x31   : > { %1443 = shalt.err (!%p1440_p3)
}
  0x32   : > { %s1517_s23 = smov [#allocation5]   ;;  %p1146_p10 = scmp.ge.s32.totalorder %s1514_s12, 2 }
  0x33   : > { %1367 = dma.vmem_to_smem (!%p1640_p0), %s274_s28, 16, %s1517_s23, [#allocation6]  }
  0x34   : > { %298 = sbr.rel (%p1146_p10) target bundleno = 83 (0x53), region = 48  ;;  %p2089_p4 = scmp.ne.s32.totalorder (!%p1146_p10), %s2082_s19, 0 }
  0x3b   : > { %301 = sbr.rel (!%p2089_p4) target bundleno = 83 (0x53), region = 52  ;;  %s303_s24 = sand.u32 (%p2089_p4), 1, %s1510_s11  }
  0x3c   : > { %s1147_s25 = sshll.u32 (%p2089_p4), %s1514_s12, 3  ;;  %s1349_s26 = smul.u32 (%p2089_p4), 216, %s303_s24 }
  0x3d   : > { %s2090_s2 = sld [smem:[#allocation15_spill]] (%p2089_p4) }
  0x3e   : > { %s1668_s19 = scalar_lea.vmem (%p2089_p4), [#allocation7], %s1349_s26 }
  0x43   : > { %s1660_s16 = scalar_lea.vmem %s2090_s2, %s1147_s25 }
  0x44   : > { %v387_v0 = vld [vmem:[%s1660_s16] sm:$0xff]  ;;  %v389_v1 = vld [vmem:[%s1660_s16 + $0x10] sm:$0xff] }
  0x45   : > { %v391_v2 = vld [vmem:[%s1660_s16 + $0x20] sm:$0xff]  ;;  %v393_v3 = vld [vmem:[%s1660_s16 + $0x30] sm:$0xff]  ;;  %388 = vst [vmem:[%s1668_s19] sm:$0xff] %v387_v0  ;;  %390 = vst [vmem:[%s1668_s19 + $0x8] sm:$0xff] %v389_v1 }
  0x46   : > { %v395_v4 = vld [vmem:[%s1660_s16 + $0x40] sm:$0xff]  ;;  %v397_v5 = vld [vmem:[%s1660_s16 + $0x50] sm:$0xff]  ;;  %392 = vst [vmem:[%s1668_s19 + $0x10] sm:$0xff] %v391_v2  ;;  %394 = vst [vmem:[%s1668_s19 + $0x18] sm:$0xff] %v393_v3 }
  0x47   : > { %396 = vst [vmem:[%s1668_s19 + $0x20] sm:$0xff] %v395_v4  ;;  %398 = vst [vmem:[%s1668_s19 + $0x28] sm:$0xff] %v397_v5  ;;  %v399_v6 = vld [vmem:[%s1660_s16 + $0x60] sm:$0xff]  ;;  %v401_v7 = vld [vmem:[%s1660_s16 + $0x70] sm:$0xff] }
  0x48   : > { %v403_v8 = vld [vmem:[%s1660_s16 + $0x80] sm:$0xff]  ;;  %400 = vst [vmem:[%s1668_s19 + $0x30] sm:$0xff] %v399_v6  ;;  %402 = vst [vmem:[%s1668_s19 + $0x38] sm:$0xff] %v401_v7  ;;  %v405_v9 = vld [vmem:[%s1660_s16 + $0x90] sm:$0xff] }
  0x49   : > { %404 = vst [vmem:[%s1668_s19 + $0x40] sm:$0xff] %v403_v8  ;;  %v407_v10 = vld [vmem:[%s1660_s16 + $0xa0] sm:$0xff]  ;;  %v409_v11 = vld [vmem:[%s1660_s16 + $0xb0] sm:$0xff]  ;;  %406 = vst [vmem:[%s1668_s19 + $0x48] sm:$0xff] %v405_v9 }
  0x4a   : > { %408 = vst [vmem:[%s1668_s19 + $0x50] sm:$0xff] %v407_v10  ;;  %410 = vst [vmem:[%s1668_s19 + $0x58] sm:$0xff] %v409_v11  ;;  %v411_v12 = vld [vmem:[%s1660_s16 + $0xc0] sm:$0xff]  ;;  %v413_v13 = vld [vmem:[%s1660_s16 + $0xd0] sm:$0xff] }
  0x4b   : > { %v415_v14 = vld [vmem:[%s1660_s16 + $0xe0] sm:$0xff]  ;;  %412 = vst [vmem:[%s1668_s19 + $0x60] sm:$0xff] %v411_v12  ;;  %414 = vst [vmem:[%s1668_s19 + $0x68] sm:$0xff] %v413_v13  ;;  %v417_v15 = vld [vmem:[%s1660_s16 + $0xf0] sm:$0xff] }
  0x4c   : > { %416 = vst [vmem:[%s1668_s19 + $0x70] sm:$0xff] %v415_v14  ;;  %v419_v16 = vld [vmem:[%s1660_s16 + $0x100] sm:$0xff]  ;;  %v421_v17 = vld [vmem:[%s1660_s16 + $0x110] sm:$0xff]  ;;  %418 = vst [vmem:[%s1668_s19 + $0x78] sm:$0xff] %v417_v15 }
  0x4d   : > { %420 = vst [vmem:[%s1668_s19 + $0x80] sm:$0xff] %v419_v16  ;;  %422 = vst [vmem:[%s1668_s19 + $0x88] sm:$0xff] %v421_v17  ;;  %v423_v18 = vld [vmem:[%s1660_s16 + $0x120] sm:$0xff]  ;;  %v425_v19 = vld [vmem:[%s1660_s16 + $0x130] sm:$0xff] }
  0x4e   : > { %v427_v20 = vld [vmem:[%s1660_s16 + $0x140] sm:$0xff]  ;;  %424 = vst [vmem:[%s1668_s19 + $0x90] sm:$0xff] %v423_v18  ;;  %426 = vst [vmem:[%s1668_s19 + $0x98] sm:$0xff] %v425_v19  ;;  %v429_v21 = vld [vmem:[%s1660_s16 + $0x150] sm:$0xff] }
  0x4f   : > { %428 = vst [vmem:[%s1668_s19 + $0xa0] sm:$0xff] %v427_v20  ;;  %v431_v22 = vld [vmem:[%s1660_s16 + $0x160] sm:$0xff]  ;;  %v433_v23 = vld [vmem:[%s1660_s16 + $0x170] sm:$0xff]  ;;  %430 = vst [vmem:[%s1668_s19 + $0xa8] sm:$0xff] %v429_v21 }
  0x50   : > { %432 = vst [vmem:[%s1668_s19 + $0xb0] sm:$0xff] %v431_v22  ;;  %434 = vst [vmem:[%s1668_s19 + $0xb8] sm:$0xff] %v433_v23  ;;  %v435_v24 = vld [vmem:[%s1660_s16 + $0x180] sm:$0xff]  ;;  %v437_v25 = vld [vmem:[%s1660_s16 + $0x190] sm:$0xff] }
  0x51   : > { %v439_v26 = vld [vmem:[%s1660_s16 + $0x1a0] sm:$0xff]  ;;  %436 = vst [vmem:[%s1668_s19 + $0xc0] sm:$0xff] %v435_v24  ;;  %438 = vst [vmem:[%s1668_s19 + $0xc8] sm:$0xff] %v437_v25 }
  0x52   : > { %440 = vst [vmem:[%s1668_s19 + $0xd0] sm:$0xff] %v439_v26 }
  0x53 PF: > { %p2091_p5 = scmp.ne.s32.totalorder %s2085_s22, 0 }
  0x54   : > { %p2092_p6 = scmp.eq.s32.totalorder (!%p2091_p5), %s1593_s13, 0 }
  0x55   : > { %449 = sbr.rel (%p2091_p5) target bundleno = 623 (0x26f), region = 90 }
  0x5c   : > { %1489 = dma.done.wait (%p2092_p6), [#allocation4], 32   ;;  %p2093_p11 = pmov %p2092_p6 }
  0x5d   : > { %p2094_p12 = pmov %p2092_p6 }
  0x5e   : > { %1491 = vsyncadd (%p2093_p11), [#allocation4], 4294967264 }
  0x5f   : > { %1493 = dma.done.wait (%p2094_p12), [#allocation6], 16   ;;  %p2095_p0 = pmov %p2092_p6 }
  0x60   : > { %s1729_s28 = sand.u32 1, %s1506_s10  }
  0x61   : > { %1495 = vsyncadd (%p2095_p0), [#allocation6], 4294967280  ;;  %s1350_s29 = smul.u32 216, %s1729_s28 }
  0x63   : > { %s1732_s17 = scalar_lea.vmem [#allocation7], %s1350_s29 }
  0x64   : > { %466 = sfence }
  0x65   : > { %s2096_s3 = sld [smem:[#allocation16_spill]]  ;;  %v1518_v30 = vmov 0.0|0.0   ;;  %s1754_s24 = sld [smem:[#allocation2]]  ;;  %vm1519_vm0 = vmmov 0   ;;  %v1520_v38 = vmov 0.0   ;;  %v495_v49 = vld [vmem:[%s1732_s17] sm:$0xff] }
  0x66   : > { %1317 = vmatprep.subr.bf16.mxu1 %v1518_v30  ;;  %1329 = vmatprep.subr.bf16.mxu0 %v1518_v30  ;;  %s1764_s14 = sld [smem:[#allocation2 + $0x80]]  ;;  %s1768_s16 = sld [smem:[#allocation2 + $0x1]]  ;;  %v1152_v54 = vld [vmem:[%s1732_s17 + $0x8] sm:$0xff]  ;;  %v1155_v56 = vld [vmem:[%s1732_s17 + $0x10] sm:$0xff]  ;;  %v1158_v60 = vld [vmem:[%s1732_s17 + $0x18] sm:$0xff]  ;;  %vm772_vm1 = vcmask 523264  }
  0x67   : > { %1284 = vmatprep.mubr.msk.f32.mxu1 %vm1519_vm0, %v1520_v38  ;;  %1303 = vmatprep.mubr.msk.f32.mxu0 %vm1519_vm0, %v1520_v38  ;;  %s1777_s23 = sld [smem:[#allocation2 + $0x81]]  ;;  %s1786_s2 = sld [smem:[#allocation2 + $0x2]]  ;;  %v1161_v1 = vld [vmem:[%s1732_s17 + $0x20] sm:$0xff]  ;;  %v1164_v10 = vld [vmem:[%s1732_s17 + $0x28] sm:$0xff]  ;;  %v1167_v19 = vld [vmem:[%s1732_s17 + $0x30] sm:$0xff]  ;;  %vm971_vm5 = vcmask 261120  }
  0x68   : > { %s1794_s18 = sld [smem:[#allocation2 + $0x82]]  ;;  %s1796_s25 = sld [smem:[#allocation2 + $0x3]]  ;;  %v1170_v24 = vld [vmem:[%s1732_s17 + $0x38] sm:$0xff] }
  0x69   : > { %s1803_s27 = sld [smem:[#allocation2 + $0x83]]  ;;  %s1805_s0 = sld [smem:[#allocation2 + $0x4]] }
  0x6a   : > { %s1813_s22 = sld [smem:[#allocation2 + $0x84]]  ;;  %s1815_s1 = sld [smem:[#allocation2 + $0x5]] }
  0x6b   : > { %v780_v27 = vld [vmem:[%s2096_s3] sm:$0xff]  ;;  %v781_v28 = vld [vmem:[%s2096_s3 + $0x8] sm:$0xff]  ;;  %v782_v33 = vld [vmem:[%s2096_s3 + $0x10] sm:$0xff]  ;;  %v497_v50 = vstv %s1754_s24  ;;  %s1820_s24 = sld [smem:[#allocation2 + $0x85]]  ;;  %s1822_s26 = sld [smem:[#allocation2 + $0x6]] }
  0x6c   : > { %v1232_v29 = vld [vmem:[%s2096_s3 + $0x40] sm:$0xff]  ;;  %v1318_v31 = vpack.c.bf16 %v781_v28, %v780_v27  ;;  %v1233_v32 = vld [vmem:[%s2096_s3 + $0x48] sm:$0xff]  ;;  %v783_v34 = vld [vmem:[%s2096_s3 + $0x18] sm:$0xff]  ;;  %v501_v53 = vstv %s1764_s14  ;;  %v498_v58 = vmul.f32 %v497_v50, %v495_v49  ;;  %s1826_s14 = sld [smem:[#allocation2 + $0x86]]  ;;  %s1828_s19 = sld [smem:[#allocation2 + $0x7]] }
  0x6d   : > { %v1330_v35 = vpack.c.bf16 %v1233_v32, %v1232_v29  ;;  %v1234_v36 = vld [vmem:[%s2096_s3 + $0x50] sm:$0xff]  ;;  %v1235_v37 = vld [vmem:[%s2096_s3 + $0x58] sm:$0xff]  ;;  %v1321_v39 = vpack.c.bf16 %v783_v34, %v782_v33  ;;  %v784_v41 = vld [vmem:[%s2096_s3 + $0x20] sm:$0xff]  ;;  %v507_v55 = vstv %s1768_s16  ;;  %v502_v62 = vmul.f32 %v501_v53, %v495_v49  ;;  %s1832_s16 = sld [smem:[#allocation2 + $0x87]]  ;;  %s1834_s29 = sld [smem:[#allocation2 + $0x8]] }
  0x6e   : > { %1319 = vmatpush3.bf16.msra.mxu1 %v1318_v31  ;;  %v1333_v40 = vpack.c.bf16 %v1235_v37, %v1234_v36  ;;  %v785_v42 = vld [vmem:[%s2096_s3 + $0x28] sm:$0xff]  ;;  %v1236_v43 = vld [vmem:[%s2096_s3 + $0x60] sm:$0xff]  ;;  %v786_v45 = vld [vmem:[%s2096_s3 + $0x30] sm:$0xff]  ;;  %v511_v59 = vstv %s1777_s23  ;;  %v508_v63 = vmul.f32 %v1152_v54, %v507_v55  ;;  %s1839_s23 = sld [smem:[#allocation2 + $0x88]]  ;;  %p2097_p7 = scmp.ne.s32.totalorder %s2083_s20, 0 }
  0x6f   : > { %1331 = vmatpush3.bf16.msra.mxu0 %v1330_v35  ;;  %1320 = vmatprep.subr.bf16.mxu1 %v1518_v30  ;;  %v1237_v44 = vld [vmem:[%s2096_s3 + $0x68] sm:$0xff]  ;;  %v787_v46 = vld [vmem:[%s2096_s3 + $0x38] sm:$0xff]  ;;  %v1324_v47 = vpack.c.bf16 %v785_v42, %v784_v41  ;;  %v1238_v48 = vld [vmem:[%s2096_s3 + $0x70] sm:$0xff]  ;;  %v517_v0 = vstv %s1786_s2  ;;  %v512_v2 = vmul.f32 %v1152_v54, %v511_v59  ;;  %s1845_s2 = sld [smem:[#allocation2 + $0x9]] }
  0x70   : > { %1332 = vmatprep.subr.bf16.mxu0 %v1518_v30  ;;  %v1336_v51 = vpack.c.bf16 %v1237_v44, %v1236_v43  ;;  %v1239_v52 = vld [vmem:[%s2096_s3 + $0x78] sm:$0xff]  ;;  %v1327_v57 = vpack.c.bf16 %v787_v46, %v786_v45  ;;  %v518_v3 = vmul.f32 %v1155_v56, %v517_v0  ;;  %v521_v4 = vstv %s1794_s18  ;;  %s1847_s3 = sld [smem:[#allocation2 + $0x89]]  ;;  %s1850_s18 = sld [smem:[#allocation2 + $0xa]]  ;;  %v1179_v49 = vld [vmem:[%s1732_s17 + $0x50] sm:$0xff] }
  0x71   : > { %v1339_v61 = vpack.c.bf16 %v1239_v52, %v1238_v48  ;;  %v527_v5 = vstv %s1796_s25  ;;  %v522_v6 = vmul.f32 %v1155_v56, %v521_v4  ;;  %v531_v8 = vstv %s1803_s27  ;;  %s1854_s25 = sld [smem:[#allocation2 + $0x8a]]  ;;  %s1856_s27 = sld [smem:[#allocation2 + $0xb]]  ;;  %v1173_v29 = vld [vmem:[%s1732_s17 + $0x40] sm:$0xff]  ;;  %v1182_v54 = vld [vmem:[%s1732_s17 + $0x58] sm:$0xff] }
  0x72   : > { %1322 = vmatpush3.bf16.msra.mxu1 %v1321_v39  ;;  %v528_v7 = vmul.f32 %v1158_v60, %v527_v5  ;;  %v537_v9 = vstv %s1805_s0  ;;  %v519_v11 = vadd.f32 %v518_v3, %v498_v58  ;;  %v532_v12 = vmul.f32 %v1158_v60, %v531_v8  ;;  %s1864_s0 = sld [smem:[#allocation2 + $0x8b]]  ;;  %v1185_v59 = vld [vmem:[%s1732_s17 + $0x60] sm:$0xff]  ;;  %v1188_v4 = vld [vmem:[%s1732_s17 + $0x68] sm:$0xff] }
  0x73   : > { %1334 = vmatpush3.bf16.msra.mxu0 %v1333_v40  ;;  %1323 = vmatprep.subr.bf16.mxu1 %v1518_v30  ;;  %v538_v13 = vmul.f32 %v1161_v1, %v537_v9  ;;  %v541_v14 = vstv %s1813_s22  ;;  %v523_v15 = vadd.f32 %v522_v6, %v502_v62  ;;  %v547_v18 = vstv %s1815_s1  ;;  %s1866_s22 = sld [smem:[#allocation2 + $0xc]]  ;;  %v1176_v40 = vld [vmem:[%s1732_s17 + $0x48] sm:$0xff] }
  0x74   : > { %1335 = vmatprep.subr.bf16.mxu0 %v1518_v30  ;;  %v529_v16 = vadd.f32 %v528_v7, %v508_v63  ;;  %v542_v17 = vmul.f32 %v1161_v1, %v541_v14  ;;  %v533_v20 = vadd.f32 %v532_v12, %v512_v2  ;;  %v548_v22 = vmul.f32 %v1164_v10, %v547_v18  ;;  %s1869_s1 = sld [smem:[#allocation2 + $0x8c]]  ;;  %v1194_v18 = vld [vmem:[%s1732_s17 + $0x78] sm:$0xff] }
  0x75   : > { %v539_v21 = vadd.f32 %v538_v13, %v519_v11  ;;  %v551_v23 = vstv %s1820_s24  ;;  %v557_v27 = vstv %s1822_s26  ;;  %v561_v28 = vstv %s1826_s14  ;;  %s1874_s24 = sld [smem:[#allocation2 + $0xd]]  ;;  %s1878_s14 = sld [smem:[#allocation2 + $0xe]]  ;;  %v1191_v13 = vld [vmem:[%s1732_s17 + $0x70] sm:$0xff] }
  0x76   : > { %1325 = vmatpush3.bf16.msra.mxu1 %v1324_v47  ;;  %v543_v25 = vadd.f32 %v542_v17, %v523_v15  ;;  %v552_v26 = vmul.f32 %v1164_v10, %v551_v23  ;;  %v549_v31 = vadd.f32 %v548_v22, %v529_v16  ;;  %v558_v32 = vmul.f32 %v1167_v19, %v557_v27  ;;  %s1876_s26 = sld [smem:[#allocation2 + $0x8d]]  ;;  %v1197_v23 = vld [vmem:[%s1732_s17 + $0x80] sm:$0xff] }
  0x77   : > { %1337 = vmatpush3.bf16.msra.mxu0 %v1336_v51  ;;  %1326 = vmatprep.subr.bf16.mxu1 %v1518_v30  ;;  %v562_v33 = vmul.f32 %v1167_v19, %v561_v28  ;;  %v567_v34 = vstv %s1828_s19  ;;  %v571_v37 = vstv %s1832_s16  ;;  %v577_v39 = vstv %s1834_s29  ;;  %s1884_s19 = sld [smem:[#allocation2 + $0x8e]]  ;;  %s1886_s16 = sld [smem:[#allocation2 + $0xf]] }
  0x78   : > { %1338 = vmatprep.subr.bf16.mxu0 %v1518_v30  ;;  %v553_v35 = vadd.f32 %v552_v26, %v533_v20  ;;  %v568_v36 = vmul.f32 %v1170_v24, %v567_v34  ;;  %v559_v41 = vadd.f32 %v558_v32, %v539_v21  ;;  %v572_v43 = vmul.f32 %v1170_v24, %v571_v37  ;;  %s1893_s29 = sld [smem:[#allocation2 + $0x8f]] }
  0x79   : > { %v563_v42 = vadd.f32 %v562_v33, %v543_v25  ;;  %v578_v44 = vmul.f32 %v1173_v29, %v577_v39  ;;  %v581_v46 = vstv %s1839_s23  ;;  %v587_v47 = vstv %s1845_s2  ;;  %s1897_s23 = sld [smem:[#allocation2 + $0x90]]  ;;  %s1902_s2 = sld [smem:[#allocation2 + $0x11]]  ;;  %v1200_v33 = vld [vmem:[%s1732_s17 + $0x88] sm:$0xff] }
  0x7a   : > { %1328 = vmatpush3.bf16.msra.mxu1 %v1327_v57  ;;  %v569_v45 = vadd.f32 %v568_v36, %v549_v31  ;;  %v591_v48 = vstv %s1847_s3  ;;  %v573_v50 = vadd.f32 %v572_v43, %v553_v35  ;;  %v582_v52 = vmul.f32 %v1173_v29, %v581_v46  ;;  %s1895_s3 = sld [smem:[#allocation2 + $0x10]]  ;;  %v1203_v43 = vld [vmem:[%s1732_s17 + $0x90] sm:$0xff] }
  0x7b   : > { %1340 = vmatpush3.bf16.msra.mxu0 %v1339_v61  ;;  %1341 = vmatprep.subr.bf16.mxu1 %v1518_v30  ;;  %v579_v51 = vadd.f32 %v578_v44, %v559_v41  ;;  %v588_v53 = vmul.f32 %v1176_v40, %v587_v47  ;;  %v592_v55 = vmul.f32 %v1176_v40, %v591_v48  ;;  %v597_v56 = vstv %s1850_s18  ;;  %s1904_s18 = sld [smem:[#allocation2 + $0x91]]  ;;  %v1206_v48 = vld [vmem:[%s1732_s17 + $0x98] sm:$0xff] }
  0x7c   : > { %v601_v57 = vstv %s1854_s25  ;;  %v607_v58 = vstv %s1856_s27  ;;  %v583_v60 = vadd.f32 %v582_v52, %v563_v42  ;;  %v598_v62 = vmul.f32 %v1179_v49, %v597_v56  ;;  %s1906_s25 = sld [smem:[#allocation2 + $0x12]] }
  0x7d   : > { %v589_v61 = vadd.f32 %v588_v53, %v569_v45  ;;  %v602_v63 = vmul.f32 %v1179_v49, %v601_v57  ;;  %v593_v0 = vadd.f32 %v592_v55, %v573_v50  ;;  %v608_v1 = vmul.f32 %v1182_v54, %v607_v58  ;;  %s1912_s27 = sld [smem:[#allocation2 + $0x92]]  ;;  %v1209_v53 = vld [vmem:[%s1732_s17 + $0xa0] sm:$0xff] }
  0x7e   : > { %v611_v2 = vstv %s1864_s0  ;;  %v617_v3 = vstv %s1866_s22  ;;  %v599_v5 = vadd.f32 %v598_v62, %v579_v51  ;;  %v621_v10 = vstv %s1869_s1  ;;  %s1914_s0 = sld [smem:[#allocation2 + $0x13]]  ;;  %s1923_s1 = sld [smem:[#allocation2 + $0x14]]  ;;  %v1212_v62 = vld [vmem:[%s1732_s17 + $0xa8] sm:$0xff] }
  0x7f   : > { %v603_v6 = vadd.f32 %v602_v63, %v583_v60  ;;  %v612_v7 = vmul.f32 %v1182_v54, %v611_v2  ;;  %v618_v8 = vmul.f32 %v1185_v59, %v617_v3  ;;  %v609_v9 = vadd.f32 %v608_v1, %v589_v61  ;;  %s1921_s22 = sld [smem:[#allocation2 + $0x93]] }
  0x80   : > { %v627_v11 = vstv %s1874_s24  ;;  %v631_v12 = vstv %s1876_s26  ;;  %v622_v16 = vmul.f32 %v1185_v59, %v621_v10  ;;  %v637_v20 = vstv %s1878_s14  ;;  %s1925_s24 = sld [smem:[#allocation2 + $0x94]]  ;;  %s1930_s26 = sld [smem:[#allocation2 + $0x15]] }
  0x81   : > { %v613_v14 = vadd.f32 %v612_v7, %v593_v0  ;;  %v619_v15 = vadd.f32 %v618_v8, %v599_v5  ;;  %v628_v17 = vmul.f32 %v1188_v4, %v627_v11  ;;  %v632_v19 = vmul.f32 %v1188_v4, %v631_v12  ;;  %s1932_s14 = sld [smem:[#allocation2 + $0x95]]  ;;  %v1215_v7 = vld [vmem:[%s1732_s17 + $0xb0] sm:$0xff]  ;;  %v1218_v12 = vld [vmem:[%s1732_s17 + $0xb8] sm:$0xff] }
  0x82   : > { %v641_v21 = vstv %s1884_s19  ;;  %v647_v22 = vstv %s1886_s16  ;;  %v623_v24 = vadd.f32 %v622_v16, %v603_v6  ;;  %v638_v26 = vmul.f32 %v1191_v13, %v637_v20  ;;  %s1934_s19 = sld [smem:[#allocation2 + $0x16]] }
  0x83   : > { %v629_v25 = vadd.f32 %v628_v17, %v609_v9  ;;  %v642_v27 = vmul.f32 %v1191_v13, %v641_v21  ;;  %v633_v28 = vadd.f32 %v632_v19, %v613_v14  ;;  %v648_v29 = vmul.f32 %v1194_v18, %v647_v22  ;;  %s1940_s16 = sld [smem:[#allocation2 + $0x96]]  ;;  %v1221_v17 = vld [vmem:[%s1732_s17 + $0xc0] sm:$0xff] }
  0x84   : > { %v651_v31 = vstv %s1893_s29  ;;  %v657_v32 = vstv %s1895_s3  ;;  %v639_v34 = vadd.f32 %v638_v26, %v619_v15  ;;  %v661_v40 = vstv %s1897_s23  ;;  %s1942_s29 = sld [smem:[#allocation2 + $0x17]]  ;;  %s1951_s23 = sld [smem:[#allocation2 + $0x18]]  ;;  %v1224_v26 = vld [vmem:[%s1732_s17 + $0xc8] sm:$0xff] }
  0x85   : > { %v643_v35 = vadd.f32 %v642_v27, %v623_v24  ;;  %v652_v36 = vmul.f32 %v1194_v18, %v651_v31  ;;  %v658_v37 = vmul.f32 %v1197_v23, %v657_v32  ;;  %v649_v39 = vadd.f32 %v648_v29, %v629_v25  ;;  %s1949_s3 = sld [smem:[#allocation2 + $0x97]] }
  0x86   : > { %v667_v41 = vstv %s1902_s2  ;;  %v671_v42 = vstv %s1904_s18  ;;  %v662_v46 = vmul.f32 %v1197_v23, %v661_v40  ;;  %v677_v50 = vstv %s1906_s25  ;;  %s1953_s2 = sld [smem:[#allocation2 + $0x98]]  ;;  %s1958_s18 = sld [smem:[#allocation2 + $0x19]] }
  0x87   : > { %v653_v44 = vadd.f32 %v652_v36, %v633_v28  ;;  %v659_v45 = vadd.f32 %v658_v37, %v639_v34  ;;  %v668_v47 = vmul.f32 %v1200_v33, %v667_v41  ;;  %v672_v49 = vmul.f32 %v1200_v33, %v671_v42  ;;  %s1960_s25 = sld [smem:[#allocation2 + $0x99]]  ;;  %v1227_v36 = vld [vmem:[%s1732_s17 + $0xd0] sm:$0xff]  ;;  %s1242_s17 = sshll.u32 %s1593_s13, 4 }
  0x88   : > { %v681_v51 = vstv %s1912_s27  ;;  %v687_v52 = vstv %s1914_s0  ;;  %v663_v54 = vadd.f32 %v662_v46, %v643_v35  ;;  %v678_v56 = vmul.f32 %v1203_v43, %v677_v50  ;;  %s1966_s27 = sld [smem:[#allocation2 + $0x1a]]  ;;  %s1521_s13 = smov [#allocation8]  }
  0x89   : > { %v669_v55 = vadd.f32 %v668_v47, %v649_v39  ;;  %v682_v57 = vmul.f32 %v1203_v43, %v681_v51  ;;  %v673_v58 = vadd.f32 %v672_v49, %v653_v44  ;;  %v688_v59 = vmul.f32 %v1206_v48, %v687_v52  ;;  %s1968_s0 = sld [smem:[#allocation2 + $0x9a]] }
  0x8a   : > { %v691_v60 = vstv %s1921_s22  ;;  %v697_v61 = vstv %s1923_s1  ;;  %v679_v63 = vadd.f32 %v678_v56, %v659_v45  ;;  %v701_v4 = vstv %s1925_s24  ;;  %s766_s22 = sld [smem:[#allocation5]]  ;;  %s1231_s1 = sld [smem:[#allocation5 + $0x1]] }
  0x8b   : > { %v683_v0 = vadd.f32 %v682_v57, %v663_v54  ;;  %v692_v1 = vmul.f32 %v1206_v48, %v691_v60  ;;  %v698_v2 = vmul.f32 %v1209_v53, %v697_v61  ;;  %v689_v3 = vadd.f32 %v688_v59, %v669_v55  ;;  %s494_s24 = scalar_lea.vmem [#allocation8], %s1729_s28 }
  0x8c   : > { %v707_v5 = vstv %s1930_s26  ;;  %v711_v6 = vstv %s1932_s14  ;;  %v702_v10 = vmul.f32 %v1209_v53, %v701_v4  ;;  %v717_v14 = vstv %s1934_s19  ;;  %s1059_s26 = sshll.u32 %s494_s24, 4  ;;  %s2022_s26 = int_to_ptr.vmem [resolvable:$true] %s1059_s26 }
  0x8d   : > { %v693_v8 = vadd.f32 %v692_v1, %v673_v58  ;;  %v699_v9 = vadd.f32 %v698_v2, %v679_v63  ;;  %v708_v11 = vmul.f32 %v1212_v62, %v707_v5  ;;  %v712_v13 = vmul.f32 %v1212_v62, %v711_v6 }
  0x8e   : > { %v721_v15 = vstv %s1940_s16  ;;  %v727_v16 = vstv %s1942_s29  ;;  %v703_v18 = vadd.f32 %v702_v10, %v683_v0  ;;  %v718_v20 = vmul.f32 %v1215_v7, %v717_v14  ;;  %s2020_s16 = scalar_lea.hbm %s2073_s9, %s1242_s17  ;;  %s1047_s29 = scalar_lea.sflag [#allocation3], %s1729_s28 }
  0x8f   : > { %v709_v19 = vadd.f32 %v708_v11, %v689_v3  ;;  %v722_v21 = vmul.f32 %v1215_v7, %v721_v15  ;;  %v713_v22 = vadd.f32 %v712_v13, %v693_v8  ;;  %v728_v23 = vmul.f32 %v1218_v12, %v727_v16  ;;  %v967_v13 = vld [vmem:[%s2071_s7 + $0x8] sm:$0xff]  ;;  %v968_v15 = vld [vmem:[%s2071_s7 + $0x10] sm:$0xff] }
  0x90   : > { %v731_v24 = vstv %s1949_s3  ;;  %v737_v25 = vstv %s1951_s23  ;;  %v719_v27 = vadd.f32 %v718_v20, %v699_v9  ;;  %v741_v33 = vstv %s1953_s2  ;;  %s1444_s3 = scalar_lea.vmem %s2022_s26, 16  ;;  %s1448_s23 = sshll.u32 %s1521_s13, 4  ;;  %s1449_s23 = int_to_ptr.vmem [resolvable:$false] %s1448_s23 }
  0x91   : > { %v723_v28 = vadd.f32 %v722_v21, %v703_v18  ;;  %v732_v29 = vmul.f32 %v1218_v12, %v731_v24  ;;  %v738_v31 = vmul.f32 %v1221_v17, %v737_v25  ;;  %v729_v32 = vadd.f32 %v728_v23, %v709_v19  ;;  %v966_v12 = vld [vmem:[%s2071_s7] sm:$0xff]  ;;  %p1445_p2 = scmp.ne.s32.totalorder %s2022_s26, %s1444_s3  ;;  %s1450_s2 = scalar_lea.vmem %s1449_s23, 32 }
  0x92   : > { %v747_v34 = vstv %s1958_s18  ;;  %v751_v35 = vstv %s1960_s25  ;;  %v742_v40 = vmul.f32 %v1221_v17, %v741_v33  ;;  %v757_v43 = vstv %s1966_s27  ;;  %v764_v17 = vld [vmem:[%s2068_s4] sm:$0x1]  ;;  %p1451_p13 = scmp.lt.s32.totalorder %s2022_s26, %s1449_s23  ;;  %p1452_p1 = scmp.lt.s32.totalorder %s1450_s2, %s1444_s3 }
  0x93   : > { %v733_v37 = vadd.f32 %v732_v29, %v713_v22  ;;  %v739_v39 = vadd.f32 %v738_v31, %v719_v27  ;;  %v748_v41 = vmul.f32 %v1224_v26, %v747_v34  ;;  %v752_v42 = vmul.f32 %v1224_v26, %v751_v35  ;;  %v962_v24 = vld [vmem:[%s2069_s5] sm:$0x1]  ;;  %p1446_p8 = pnand %p1445_p2, %p2097_p7 }
  0x94   : > { %v761_v44 = vstv %s1968_s0  ;;  %v743_v45 = vadd.f32 %v742_v40, %v723_v28  ;;  %v758_v47 = vmul.f32 %v1227_v36, %v757_v43  ;;  %v767_v52 = vstv %s766_s22  ;;  %v964_v26 = vld [vmem:[%s2070_s6] sm:$0x1]  ;;  %p1453_p3 = por %p1452_p1, %p1451_p13 }
  0x95   : > { %v749_v46 = vadd.f32 %v748_v41, %v729_v32  ;;  %v762_v48 = vmul.f32 %v1227_v36, %v761_v44  ;;  %v753_v49 = vadd.f32 %v752_v42, %v733_v37  ;;  %v864_v53 = vstv %s1231_s1  ;;  %v970_v29 = vld [vmem:[%s2072_s8] sm:$0x1]  ;;  %p1447_p9 = pneg %p1446_p8 }
  0x96   : > { %v759_v50 = vadd.f32 %v758_v47, %v739_v39  ;;  %v1342_v14 = vpack.c.bf16 %v967_v13, %v966_v12 }
  0x97   : > { %v763_v51 = vadd.f32 %v762_v48, %v743_v45  ;;  %p1454_p4 = pnand %p1453_p3, %p1447_p9 }
  0x98   : > { %v765_v54 = vadd.f32 %v759_v50, %v749_v46 }
  0x99   : > { %v862_v55 = vadd.f32 %v763_v51, %v753_v49 }
  0x9a   : > { %v768_v56 = vadd.f32 %v767_v52, %v765_v54 }
  0x9b   : > { %v865_v57 = vadd.f32 %v864_v53, %v862_v55 }
  0x9c   : > { %vm769_vm2 = vcmp.ge.f32.partialorder %v768_v56, 0.0  ;;  %v770_v58 = vmul.f32 0.01, %v768_v56 }
  0x9d   : > { %vm866_vm3 = vcmp.ge.f32.partialorder %v865_v57, 0.0  ;;  %v867_v59 = vmul.f32 0.01, %v865_v57 }
  0x9e   : > { %v771_v60 = vsel %vm769_vm2, %v768_v56, %v770_v58 }
  0x9f   : > { %v868_v61 = vsel %vm866_vm3, %v865_v57, %v867_v59  ;;  %v773_v62 = vsel %vm772_vm1, %v771_v60, -inf }
  0xa0   : > { %v869_v63 = vsel %vm772_vm1, %v868_v61, -inf  ;;  %v774_v0 = vrot.slane %v773_v62, 4 }
  0xa1   : > { %v870_v1 = vrot.slane %v869_v63, 4 }
  0xa2   : > { %v775_v2 = vmax.f32 %v773_v62, %v774_v0 }
  0xa3   : > { %v871_v3 = vmax.f32 %v869_v63, %v870_v1 }
  0xa4   : > { %v776_v4 = vrot.slane %v775_v2, 2 }
  0xa5   : > { %v872_v5 = vrot.slane %v871_v3, 2 }
  0xa6   : > { %v777_v6 = vmax.f32 %v775_v2, %v776_v4 }
  0xa7   : > { %v873_v7 = vmax.f32 %v871_v3, %v872_v5 }
  0xa8   : > { %v778_v8 = vrot.slane %v777_v6, 1 }
  0xa9   : > { %v874_v9 = vrot.slane %v873_v7, 1 }
  0xaa   : > { %v779_v10 = vmax.f32 %v777_v6, %v778_v8 }
  0xab   : > { %v875_v11 = vmax.f32 %v873_v7, %v874_v9 }
  0xac   : > { %1285 = vmatmul.mubr.msk.f32.vlgmr.msra.gmra.mrb[0].mxu1 %vm772_vm1, %v779_v10 }
  0xad   : > { %1304 = vmatmul.mubr.msk.f32.vlgmr.msra.gmra.mrb[0].mxu0 %vm772_vm1, %v875_v11  ;;  %1314 = vmatprep.mubr.msk.f32.mxu1 %vm1519_vm0, %v1520_v38  ;;  %v969_v38 = vld [vmem:[%s2071_s7 + $0x18] sm:$0xff] }
  0xae   : > { %1343 = vmatpush3.bf16.msra.mxu1 %v1342_v14  ;;  %v1345_v16 = vpack.c.bf16 %v969_v38, %v968_v15 }
  0xaf   : > { %1344 = vmatprep.subr.bf16.mxu1 %v1518_v30 }
  0xb2   : > { %1346 = vmatpush3.bf16.msra.mxu1 %v1345_v16 }
 0x17f   : > { %v857_v18 = vpop.f32.mrb[0].mxu1 }
 0x180   : > { %v954_v19 = vpop.f32.mrb[0].mxu0  ;;  %v861_v20 = vadd.f32 %v857_v18, %v764_v17  ;;  %v1286_v30 = vpop.f32.mrb[1].mxu1 }
 0x181   : > { %v1305_v21 = vpop.f32.mrb[1].mxu0 }
 0x182   : > { %v958_v22 = vadd.f32 %v954_v19, %v861_v20 }
 0x184   : > { %vm959_vm4 = vcmp.ge.f32.partialorder %v958_v22, 0.0  ;;  %v960_v23 = vmul.f32 0.01, %v958_v22 }
 0x186   : > { %v961_v25 = vsel %vm959_vm4, %v958_v22, %v960_v23 }
 0x187   : > { %v963_v27 = vmul.f32 %v962_v24, %v961_v25 }
 0x189   : > { %v965_v28 = vadd.f32 %v964_v26, %v963_v27 }
 0x18b   : > { %1315 = vmatmul.mubr.msk.f32.vlgmr.msra.gmra.mrb[2].mxu1 %vm971_vm5, %v965_v28 }
 0x25e   : > { %v1041_v31 = vpop.f32.mrb[2].mxu1 }
 0x25f   : > { %v1042_v32 = vadd.f32 %v1041_v31, %v970_v29  ;;  %v1316_v33 = vpop.f32.mrb[3].mxu1 }
 0x261   : > { %1045 = vst [vmem:[%s494_s24] sm:$0x1] %v1042_v32 }
 0x262   : > { %1457 = shalt.err (!%p1454_p4)
}
 0x263   : > { %s1458_s28 = scalar_lea.hbm %s2020_s16, 16  ;;  %s1462_s27 = scalar_lea.hbm %s2073_s9, 32 }
 0x264   : > { %p1459_p5 = scmp.ne.s32.totalorder %s2020_s16, %s1458_s28  ;;  %p1463_p12 = scmp.lt.u32.totalorder %s2020_s16, %s2073_s9 }
 0x265   : > { %p1464_p0 = scmp.lt.u32.totalorder %s1462_s27, %s1458_s28  ;;  %p1466_p8 = scmp.lt.u32.totalorder %s1458_s28, %s2020_s16 }
 0x266   : > { %p1460_p6 = pnand %p1459_p5, %p2097_p7 }
 0x267   : > { %p1465_p2 = por %p1464_p0, %p1463_p12 }
 0x268   : > { %p1461_p11 = pneg %p1460_p6 }
 0x269   : > { %p1467_p9 = por %p1466_p8, %p1465_p2 }
 0x26b   : > { %p1468_p13 = pnand %p1467_p9, %p1461_p11 }
 0x26d   : > { %1471 = shalt.err (!%p1468_p13)
}
 0x26e   : > { %1359 = dma.vmem_to_hbm [thread:$0]  (%p2097_p7), %s2022_s26, 16, %s2020_s16, %s1047_s29  }
 0x26f PF: > { %s1071_s1 = sand.u32 1, %s1502_s30   ;;  %p2098_p1 = scmp.ne.s32.totalorder %s2084_s21, 0 }
 0x270   : > { %s1072_s17 = scalar_lea.sflag [#allocation3], %s1071_s1 }
 0x271   : > { %p1369_p3 = pnand %p1146_p10, %p2098_p1 }
 0x273   : > { %1497 = dma.done.wait (!%p1369_p3), %s1072_s17, 16  }
 0x274   : > { %1499 = vsyncadd (!%p1369_p3), %s1072_s17, 4294967280  ;;  %s2099_s24 = sld [smem:[#allocation12_spill]]  ;;  %p21_p4 = scmp.ge.s32.totalorder %s1597_s15, 4  }
 0x275   : > { %s2100_s30 = smov %s1506_s10  ;;  %s2101_s10 = smov %s1510_s11 }
 0x276   : > { %s2103_s12 = smov %s1597_s15  ;;  %23 = sbr.rel (!%p21_p4) target bundleno = 10 (0xa), region = 170 }
 0x27a   : > { %s2102_s11 = smov %s2099_s24 }
 0x27d   :  { %1076 = vsyncpa [#allocation3], 1 }
 0x27e   :  { %1078 = vsyncpa [#allocation3 + $0x1], 1 }
 0x27f   :  { %1079 = vsyncpa [#allocation4], 1 }
 0x280   :  { %1081 = vsyncpa [#allocation4 + $0x1], 1 }
 0x281   :  { %1082 = vsyncpa [#allocation6], 1 }

</bundles_post_ra>
